<compile_context>
chip_gen: v7x
topology: tpu7x:2x2x1
jax: 0.10.0
libtpu: 0.0.40
codegen_flags: <defaults>
</compile_context>

<pallas_src>
import functools
import math

import jax
import jax.numpy as jnp
from jax.experimental import pallas as pl
from jax.experimental.pallas import tpu as pltpu


def _layer_norm(y, w, b, eps=1e-5):
    mu = jnp.mean(y, axis=-1, keepdims=True)
    var = jnp.mean((y - mu) ** 2, axis=-1, keepdims=True)
    return (y - mu) * jax.lax.rsqrt(var + eps) * w + b


def encoder_stack_kernel(x_ref,
                         wqkv_ref, bqkv_ref, wo_ref, bo_ref,
                         w1_ref, b1_ref, w2_ref, b2_ref,
                         ln1w_ref, ln1b_ref, ln2w_ref, ln2b_ref,
                         out_ref, *, num_heads, ff_chunk):
    layer = pl.program_id(1)

    # Seed the carried activation at layer 0; it stays resident in VMEM (same
    # output block index for every layer), so layers chain without HBM traffic.
    @pl.when(layer == 0)
    def _():
        out_ref[...] = x_ref[...]

    x = out_ref[0]                                 # (S, H) float32
    S, H = x.shape
    hd = H // num_heads
    scale = 1.0 / math.sqrt(hd)

    x_bf = x.astype(jnp.bfloat16)

    # ---- fused QKV projection (weights already (H, 3H); bf16 MXU, f32 acc) ----
    qkv = jnp.dot(x_bf, wqkv_ref[0], preferred_element_type=jnp.float32)
    qkv = qkv + bqkv_ref[0]
    q = qkv[:, :H] * scale
    k = qkv[:, H:2 * H]
    v = qkv[:, 2 * H:]

    # ---- batched multi-head attention over (nh, S, hd) ----
    def split_heads(t):                            # (S, H) f32 -> (nh, S, hd) bf16
        return jnp.stack(
            [t[:, h * hd:(h + 1) * hd] for h in range(num_heads)], axis=0
        ).astype(jnp.bfloat16)

    qh, kh, vh = split_heads(q), split_heads(k), split_heads(v)

    s = jnp.einsum("hqd,hkd->hqk", qh, kh,
                   preferred_element_type=jnp.float32)        # (nh, S, S) f32
    s = s - jnp.max(s, axis=-1, keepdims=True)
    p = jnp.exp(s)
    p = p * pl.reciprocal(jnp.sum(p, axis=-1, keepdims=True), approx=True)
    attn3 = jnp.einsum("hqk,hkd->hqd", p.astype(jnp.bfloat16), vh,
                       preferred_element_type=jnp.float32)    # (nh, S, hd) f32
    attn = jnp.concatenate([attn3[h] for h in range(num_heads)], axis=-1)

    attn = jnp.dot(attn.astype(jnp.bfloat16), wo_ref[0],
                   preferred_element_type=jnp.float32) + bo_ref[0]

    # post-norm (PyTorch default norm_first=False); dropout = identity (eval)
    x1 = _layer_norm(x + attn, ln1w_ref[0], ln1b_ref[0])
    x1_bf = x1.astype(jnp.bfloat16)

    # ---- feed-forward, streamed over ff_chunk-wide column blocks ----
    dim_ff = w1_ref.shape[-1]
    n_chunks = dim_ff // ff_chunk
    ff = jnp.zeros((S, H), jnp.float32)
    for c in range(n_chunks):                      # static unroll
        c0, c1 = c * ff_chunk, (c + 1) * ff_chunk
        w1c = w1_ref[0, :, c0:c1]                  # (H, ff_chunk)  bf16
        b1c = b1_ref[0, :, c0:c1]                  # (1, ff_chunk)  f32
        w2c = w2_ref[0, c0:c1, :]                  # (ff_chunk, H)  bf16
        h1 = jnp.dot(x1_bf, w1c, preferred_element_type=jnp.float32) + b1c
        h1 = jnp.maximum(h1, 0.0)                  # relu in f32
        ff = ff + jnp.dot(h1.astype(jnp.bfloat16), w2c,
                          preferred_element_type=jnp.float32)
    ff = ff + b2_ref[0]

    out_ref[0] = _layer_norm(x1 + ff, ln2w_ref[0], ln2b_ref[0])


def transformer_encoder_pallas(x, params, num_heads):
    """x: (B, S, H) float32. params: stacked per-layer weights (see init)."""
    B, S, H = x.shape
    L = params["wqkv"].shape[0]
    dim_ff = params["w1"].shape[-1]
    ff_chunk = 512 if dim_ff % 512 == 0 else dim_ff

    arg_names = ["wqkv", "bqkv", "wo", "bo", "w1", "b1", "w2", "b2",
                 "ln1w", "ln1b", "ln2w", "ln2b"]
    weight_args = [params[n] for n in arg_names]

    def wspec(arr):
        blk = (1,) + arr.shape[1:]
        nrest = arr.ndim - 1
        return pl.BlockSpec(blk, lambda b, l, _n=nrest: (l,) + (0,) * _n)

    in_specs = [pl.BlockSpec((1, S, H), lambda b, l: (b, 0, 0))]
    in_specs += [wspec(a) for a in weight_args]

    # advisory cost estimate for XLA scheduling around the call
    flops = B * L * S * H * (8 * H + 4 * S + 4 * dim_ff)
    transcendentals = B * L * S * (num_heads * S + num_heads + 2)
    weight_bytes_per_layer = (2 * (4 * H * H + 2 * H * dim_ff)      # bf16 mats
                              + 4 * (3 * H + H + dim_ff + H + 4 * H))  # f32 vecs
    bytes_accessed = B * L * weight_bytes_per_layer + 2 * B * S * H * 4

    return pl.pallas_call(
        functools.partial(encoder_stack_kernel,
                          num_heads=num_heads, ff_chunk=ff_chunk),
        out_shape=jax.ShapeDtypeStruct((B, S, H), jnp.float32),
        grid=(B, L),
        in_specs=in_specs,
        out_specs=pl.BlockSpec((1, S, H), lambda b, l: (b, 0, 0)),
        compiler_params=pltpu.CompilerParams(
            dimension_semantics=("parallel", "arbitrary"),
            vmem_limit_bytes=32 * 1024 * 1024),
        cost_estimate=pl.CostEstimate(
            flops=flops, transcendentals=transcendentals,
            bytes_accessed=bytes_accessed),
    )(x, *weight_args)


# ---------------- pure-JAX reference (f32 math, same bf16-rounded weights) ----
def transformer_encoder_ref(x, params, num_heads):
    B, S, H = x.shape
    L = params["wqkv"].shape[0]
    hd = H // num_heads
    scale = 1.0 / math.sqrt(hd)

    def ln(y, w, b):
        mu = y.mean(-1, keepdims=True)
        var = ((y - mu) ** 2).mean(-1, keepdims=True)
        return (y - mu) * jax.lax.rsqrt(var + 1e-5) * w + b

    for l in range(L):
        wqkv = params["wqkv"][l].astype(jnp.float32)
        wo = params["wo"][l].astype(jnp.float32)
        w1 = params["w1"][l].astype(jnp.float32)
        w2 = params["w2"][l].astype(jnp.float32)

        qkv = jnp.einsum("bsh,ho->bso", x, wqkv) + params["bqkv"][l][0]
        q, k, v = qkv[..., :H] * scale, qkv[..., H:2 * H], qkv[..., 2 * H:]

        def split(t):
            return t.reshape(B, S, num_heads, hd).transpose(0, 2, 1, 3)
        q, k, v = split(q), split(k), split(v)
        s = jnp.einsum("bnqd,bnkd->bnqk", q, k)
        p = jax.nn.softmax(s, axis=-1)
        attn = jnp.einsum("bnqk,bnkd->bnqd", p, v)
        attn = attn.transpose(0, 2, 1, 3).reshape(B, S, H)
        attn = jnp.einsum("bsh,ho->bso", attn, wo) + params["bo"][l][0]

        x1 = ln(x + attn, params["ln1w"][l][0], params["ln1b"][l][0])
        h1 = jax.nn.relu(jnp.einsum("bsh,hf->bsf", x1, w1) + params["b1"][l][0])
        ff = jnp.einsum("bsf,fh->bsh", h1, w2) + params["b2"][l][0]
        x = ln(x1 + ff, params["ln2w"][l][0], params["ln2b"][l][0])
    return x


# ---------------- deterministic parameter init (kernel layout) ----------------
def init_params(key, num_layers, hidden, dim_ff):
    def one(k):
        ks = jax.random.split(k, 6)
        w = lambda kk, shape: 0.05 * jax.random.normal(kk, shape, jnp.float32)
        # weights generated in PyTorch (out, in) layout, pre-transposed for the
        # kernel and cast to bf16; biases / LN params stay f32.
        return {
            "wqkv": w(ks[0], (3 * hidden, hidden)).T.astype(jnp.bfloat16),
            "bqkv": w(ks[1], (1, 3 * hidden)),
            "wo":   w(ks[2], (hidden, hidden)).T.astype(jnp.bfloat16),
            "bo":   jnp.zeros((1, hidden), jnp.float32),
            "w1":   w(ks[3], (dim_ff, hidden)).T.astype(jnp.bfloat16),
            "b1":   w(ks[4], (1, dim_ff)),
            "w2":   w(ks[5], (hidden, dim_ff)).T.astype(jnp.bfloat16),
            "b2":   jnp.zeros((1, hidden), jnp.float32),
            "ln1w": jnp.ones((1, hidden), jnp.float32),
            "ln1b": jnp.zeros((1, hidden), jnp.float32),
            "ln2w": jnp.ones((1, hidden), jnp.float32),
            "ln2b": jnp.zeros((1, hidden), jnp.float32),
        }
    layers = [one(k) for k in jax.random.split(key, num_layers)]
    return {name: jnp.stack([lp[name] for lp in layers]) for name in layers[0]}


if __name__ == "__main__":
    batch, seq, hidden = 2, 8, 32
    num_heads, num_layers, dim_ff = 4, 2, 2048   # PyTorch default dim_feedforward

    root = jax.random.PRNGKey(0)
    x_key, p_key = jax.random.split(root)
    x = jax.random.normal(x_key, (batch, seq, hidden), dtype=jnp.float32)
    params = init_params(p_key, num_layers, hidden, dim_ff)

    out = transformer_encoder_pallas(x, params, num_heads)
    out = jax.block_until_ready(out)

    ref = transformer_encoder_ref(x, params, num_heads)
    assert out.shape == (batch, seq, hidden)
    max_err = float(jnp.max(jnp.abs(out - ref)))
    assert jnp.allclose(out, ref, atol=3e-2, rtol=3e-2), f"mismatch, max_err={max_err}"

    print("KERNEL_OK")
</pallas_src>

<mosaic_0001>
module attributes {stable_mosaic.version = 11 : i64} {
  func.func @encoder_stack_kernel(%arg0: i32, %arg1: i32, %arg2: memref<1x8x32xf32, #tpu.memory_space<vmem>>, %arg3: memref<1x32x96xbf16, #tpu.memory_space<vmem>>, %arg4: memref<1x1x96xf32, #tpu.memory_space<vmem>>, %arg5: memref<1x32x32xbf16, #tpu.memory_space<vmem>>, %arg6: memref<1x1x32xf32, #tpu.memory_space<vmem>>, %arg7: memref<1x32x2048xbf16, #tpu.memory_space<vmem>>, %arg8: memref<1x1x2048xf32, #tpu.memory_space<vmem>>, %arg9: memref<1x2048x32xbf16, #tpu.memory_space<vmem>>, %arg10: memref<1x1x32xf32, #tpu.memory_space<vmem>>, %arg11: memref<1x1x32xf32, #tpu.memory_space<vmem>>, %arg12: memref<1x1x32xf32, #tpu.memory_space<vmem>>, %arg13: memref<1x1x32xf32, #tpu.memory_space<vmem>>, %arg14: memref<1x1x32xf32, #tpu.memory_space<vmem>>, %arg15: memref<1x8x32xf32, #tpu.memory_space<vmem>>) attributes {dimension_semantics = [#tpu.dimension_semantics<parallel>, #tpu.dimension_semantics<arbitrary>], iteration_bounds = array<i64: 2, 2>, scalar_prefetch = 0 : i64, scratch_operands = 0 : i64, tpu.core_type = #tpu.core_type<tc>, window_params = [{transform_indices = @transform_0, window_bounds = array<i64: 1, 8, 32>}, {transform_indices = @transform_1, window_bounds = array<i64: 1, 32, 96>}, {transform_indices = @transform_2, window_bounds = array<i64: 1, 1, 96>}, {transform_indices = @transform_3, window_bounds = array<i64: 1, 32, 32>}, {transform_indices = @transform_4, window_bounds = array<i64: 1, 1, 32>}, {transform_indices = @transform_5, window_bounds = array<i64: 1, 32, 2048>}, {transform_indices = @transform_6, window_bounds = array<i64: 1, 1, 2048>}, {transform_indices = @transform_7, window_bounds = array<i64: 1, 2048, 32>}, {transform_indices = @transform_8, window_bounds = array<i64: 1, 1, 32>}, {transform_indices = @transform_9, window_bounds = array<i64: 1, 1, 32>}, {transform_indices = @transform_10, window_bounds = array<i64: 1, 1, 32>}, {transform_indices = @transform_11, window_bounds = array<i64: 1, 1, 32>}, {transform_indices = @transform_12, window_bounds = array<i64: 1, 1, 32>}, {transform_indices = @transform_13, window_bounds = array<i64: 1, 8, 32>}]} {
    %c0_i32 = arith.constant 0 : i32
    %0 = arith.cmpi eq, %arg1, %c0_i32 : i32
    %1 = arith.extui %0 : i1 to i32
    %c0_i32_0 = arith.constant 0 : i32
    %2 = arith.cmpi ne, %1, %c0_i32_0 : i32
    scf.if %2 {
      %c0_95 = arith.constant 0 : index
      %c0_96 = arith.constant 0 : index
      %c0_97 = arith.constant 0 : index
      %197 = vector.load %arg2[%c0_95, %c0_96, %c0_97] : memref<1x8x32xf32, #tpu.memory_space<vmem>>, vector<1x8x32xf32>
      %c0_98 = arith.constant 0 : index
      %c0_99 = arith.constant 0 : index
      %c0_100 = arith.constant 0 : index
      %198 = vector.load %arg15[%c0_98, %c0_99, %c0_100] : memref<1x8x32xf32, #tpu.memory_space<vmem>>, vector<1x8x32xf32>
      tpu.vector_store %arg15[%c0_98, %c0_99, %c0_100], %197 {strides = array<i32>} : memref<1x8x32xf32, #tpu.memory_space<vmem>>, vector<1x8x32xf32>,
    } else {
    }
    %c0 = arith.constant 0 : index
    %c0_1 = arith.constant 0 : index
    %c0_2 = arith.constant 0 : index
    %3 = vector.load %arg15[%c0, %c0_1, %c0_2] : memref<1x8x32xf32, #tpu.memory_space<vmem>>, vector<1x8x32xf32>
    %4 = vector.shape_cast %3 : vector<1x8x32xf32> to vector<8x32xf32>
    %5 = arith.truncf %4 : vector<8x32xf32> to vector<8x32xbf16>
    %c0_3 = arith.constant 0 : index
    %c0_4 = arith.constant 0 : index
    %c0_5 = arith.constant 0 : index
    %6 = vector.load %arg3[%c0_3, %c0_4, %c0_5] : memref<1x32x96xbf16, #tpu.memory_space<vmem>>, vector<1x32x96xbf16>
    %7 = vector.shape_cast %6 : vector<1x32x96xbf16> to vector<32x96xbf16>
    %cst = arith.constant dense<0.000000e+00> : vector<8x96xf32>
    %8 = tpu.matmul %5, %7, %cst {dimension_numbers = #tpu.dot_dimension_numbers<[1], [0], [0], [1], [0, 0, 1, 1], [], []>} : vector<8x32xbf16>, vector<32x96xbf16>, vector<8x96xf32> -> vector<8x96xf32>
    %c0_6 = arith.constant 0 : index
    %c0_7 = arith.constant 0 : index
    %c0_8 = arith.constant 0 : index
    %9 = vector.load %arg4[%c0_6, %c0_7, %c0_8] : memref<1x1x96xf32, #tpu.memory_space<vmem>>, vector<1x1x96xf32>
    %10 = vector.shape_cast %9 : vector<1x1x96xf32> to vector<1x96xf32>
    %11 = vector.broadcast %10 : vector<1x96xf32> to vector<8x96xf32>
    %12 = arith.addf %8, %11 : vector<8x96xf32>
    %13 = vector.extract_strided_slice %12 {offsets = [0, 0], sizes = [8, 32], strides = [1, 1]} : vector<8x96xf32> to vector<8x32xf32>
    %cst_9 = arith.constant 0.353553385 : f32
    %14 = vector.broadcast %cst_9 : f32 to vector<8x32xf32>
    %15 = arith.mulf %13, %14 : vector<8x32xf32>
    %16 = vector.extract_strided_slice %12 {offsets = [0, 32], sizes = [8, 32], strides = [1, 1]} : vector<8x96xf32> to vector<8x32xf32>
    %17 = vector.extract_strided_slice %12 {offsets = [0, 64], sizes = [8, 32], strides = [1, 1]} : vector<8x96xf32> to vector<8x32xf32>
    %18 = vector.extract_strided_slice %15 {offsets = [0, 0], sizes = [8, 8], strides = [1, 1]} : vector<8x32xf32> to vector<8x8xf32>
    %19 = vector.extract_strided_slice %15 {offsets = [0, 8], sizes = [8, 8], strides = [1, 1]} : vector<8x32xf32> to vector<8x8xf32>
    %20 = vector.extract_strided_slice %15 {offsets = [0, 16], sizes = [8, 8], strides = [1, 1]} : vector<8x32xf32> to vector<8x8xf32>
    %21 = vector.extract_strided_slice %15 {offsets = [0, 24], sizes = [8, 8], strides = [1, 1]} : vector<8x32xf32> to vector<8x8xf32>
    %22 = vector.shape_cast %18 : vector<8x8xf32> to vector<1x8x8xf32>
    %23 = vector.shape_cast %19 : vector<8x8xf32> to vector<1x8x8xf32>
    %24 = vector.shape_cast %20 : vector<8x8xf32> to vector<1x8x8xf32>
    %25 = vector.shape_cast %21 : vector<8x8xf32> to vector<1x8x8xf32>
    %26 = tpu.concatenate %22, %23, %24, %25 in 0 : vector<1x8x8xf32>, vector<1x8x8xf32>, vector<1x8x8xf32>, vector<1x8x8xf32> -> vector<4x8x8xf32>
    %27 = arith.truncf %26 : vector<4x8x8xf32> to vector<4x8x8xbf16>
    %28 = vector.extract_strided_slice %16 {offsets = [0, 0], sizes = [8, 8], strides = [1, 1]} : vector<8x32xf32> to vector<8x8xf32>
    %29 = vector.extract_strided_slice %16 {offsets = [0, 8], sizes = [8, 8], strides = [1, 1]} : vector<8x32xf32> to vector<8x8xf32>
    %30 = vector.extract_strided_slice %16 {offsets = [0, 16], sizes = [8, 8], strides = [1, 1]} : vector<8x32xf32> to vector<8x8xf32>
    %31 = vector.extract_strided_slice %16 {offsets = [0, 24], sizes = [8, 8], strides = [1, 1]} : vector<8x32xf32> to vector<8x8xf32>
    %32 = vector.shape_cast %28 : vector<8x8xf32> to vector<1x8x8xf32>
    %33 = vector.shape_cast %29 : vector<8x8xf32> to vector<1x8x8xf32>
    %34 = vector.shape_cast %30 : vector<8x8xf32> to vector<1x8x8xf32>
    %35 = vector.shape_cast %31 : vector<8x8xf32> to vector<1x8x8xf32>
    %36 = tpu.concatenate %32, %33, %34, %35 in 0 : vector<1x8x8xf32>, vector<1x8x8xf32>, vector<1x8x8xf32>, vector<1x8x8xf32> -> vector<4x8x8xf32>
    %37 = arith.truncf %36 : vector<4x8x8xf32> to vector<4x8x8xbf16>
    %38 = vector.extract_strided_slice %17 {offsets = [0, 0], sizes = [8, 8], strides = [1, 1]} : vector<8x32xf32> to vector<8x8xf32>
    %39 = vector.extract_strided_slice %17 {offsets = [0, 8], sizes = [8, 8], strides = [1, 1]} : vector<8x32xf32> to vector<8x8xf32>
    %40 = vector.extract_strided_slice %17 {offsets = [0, 16], sizes = [8, 8], strides = [1, 1]} : vector<8x32xf32> to vector<8x8xf32>
    %41 = vector.extract_strided_slice %17 {offsets = [0, 24], sizes = [8, 8], strides = [1, 1]} : vector<8x32xf32> to vector<8x8xf32>
    %42 = vector.shape_cast %38 : vector<8x8xf32> to vector<1x8x8xf32>
    %43 = vector.shape_cast %39 : vector<8x8xf32> to vector<1x8x8xf32>
    %44 = vector.shape_cast %40 : vector<8x8xf32> to vector<1x8x8xf32>
    %45 = vector.shape_cast %41 : vector<8x8xf32> to vector<1x8x8xf32>
    %46 = tpu.concatenate %42, %43, %44, %45 in 0 : vector<1x8x8xf32>, vector<1x8x8xf32>, vector<1x8x8xf32>, vector<1x8x8xf32> -> vector<4x8x8xf32>
    %47 = arith.truncf %46 : vector<4x8x8xf32> to vector<4x8x8xbf16>
    "tpu.trace_start"() <{level = 10 : i32, message = "hqd,hkd->hqk"}> : () -> ()
    %cst_10 = arith.constant dense<0.000000e+00> : vector<4x8x8xf32>
    %48 = tpu.matmul %27, %37, %cst_10 {dimension_numbers = #tpu.dot_dimension_numbers<[2], [2], [1], [1], [0, 0, 0, 1, 1, 1], [0], [0]>} : vector<4x8x8xbf16>, vector<4x8x8xbf16>, vector<4x8x8xf32> -> vector<4x8x8xf32>
    "tpu.trace_stop"() : () -> ()
    %cst_11 = arith.constant dense<0xFF800000> : vector<4x8xf32>
    %49 = vector.multi_reduction <maximumf>, %48, %cst_11 [2] : vector<4x8x8xf32> to vector<4x8xf32>
    %50 = vector.shape_cast %49 : vector<4x8xf32> to vector<4x8x1xf32>
    %51 = vector.broadcast %50 : vector<4x8x1xf32> to vector<4x8x8xf32>
    %52 = arith.subf %48, %51 : vector<4x8x8xf32>
    %53 = math.exp %52 : vector<4x8x8xf32>
    %cst_12 = arith.constant dense<0.000000e+00> : vector<4x8xf32>
    %54 = vector.multi_reduction <add>, %53, %cst_12 [2] : vector<4x8x8xf32> to vector<4x8xf32>
    %55 = vector.shape_cast %54 : vector<4x8xf32> to vector<4x8x1xf32>
    %56 = tpu.reciprocal %55 {approx = true} : vector<4x8x1xf32> -> vector<4x8x1xf32>
    %57 = vector.broadcast %56 : vector<4x8x1xf32> to vector<4x8x8xf32>
    %58 = arith.mulf %53, %57 : vector<4x8x8xf32>
    %59 = arith.truncf %58 : vector<4x8x8xf32> to vector<4x8x8xbf16>
    "tpu.trace_start"() <{level = 10 : i32, message = "hqk,hkd->hqd"}> : () -> ()
    %cst_13 = arith.constant dense<0.000000e+00> : vector<4x8x8xf32>
    %60 = tpu.matmul %59, %47, %cst_13 {dimension_numbers = #tpu.dot_dimension_numbers<[2], [1], [1], [2], [0, 0, 0, 1, 1, 2], [0], [0]>} : vector<4x8x8xbf16>, vector<4x8x8xbf16>, vector<4x8x8xf32> -> vector<4x8x8xf32>
    "tpu.trace_stop"() : () -> ()
    %61 = vector.extract_strided_slice %60 {offsets = [0, 0, 0], sizes = [1, 8, 8], strides = [1, 1, 1]} : vector<4x8x8xf32> to vector<1x8x8xf32>
    %62 = vector.shape_cast %61 : vector<1x8x8xf32> to vector<8x8xf32>
    %63 = vector.extract_strided_slice %60 {offsets = [1, 0, 0], sizes = [1, 8, 8], strides = [1, 1, 1]} : vector<4x8x8xf32> to vector<1x8x8xf32>
    %64 = vector.shape_cast %63 : vector<1x8x8xf32> to vector<8x8xf32>
    %65 = vector.extract_strided_slice %60 {offsets = [2, 0, 0], sizes = [1, 8, 8], strides = [1, 1, 1]} : vector<4x8x8xf32> to vector<1x8x8xf32>
    %66 = vector.shape_cast %65 : vector<1x8x8xf32> to vector<8x8xf32>
    %67 = vector.extract_strided_slice %60 {offsets = [3, 0, 0], sizes = [1, 8, 8], strides = [1, 1, 1]} : vector<4x8x8xf32> to vector<1x8x8xf32>
    %68 = vector.shape_cast %67 : vector<1x8x8xf32> to vector<8x8xf32>
    %69 = tpu.concatenate %62, %64, %66, %68 in 1 : vector<8x8xf32>, vector<8x8xf32>, vector<8x8xf32>, vector<8x8xf32> -> vector<8x32xf32>
    %70 = arith.truncf %69 : vector<8x32xf32> to vector<8x32xbf16>
    %c0_14 = arith.constant 0 : index
    %c0_15 = arith.constant 0 : index
    %c0_16 = arith.constant 0 : index
    %71 = vector.load %arg5[%c0_14, %c0_15, %c0_16] : memref<1x32x32xbf16, #tpu.memory_space<vmem>>, vector<1x32x32xbf16>
    %72 = vector.shape_cast %71 : vector<1x32x32xbf16> to vector<32x32xbf16>
    %cst_17 = arith.constant dense<0.000000e+00> : vector<8x32xf32>
    %73 = tpu.matmul %70, %72, %cst_17 {dimension_numbers = #tpu.dot_dimension_numbers<[1], [0], [0], [1], [0, 0, 1, 1], [], []>} : vector<8x32xbf16>, vector<32x32xbf16>, vector<8x32xf32> -> vector<8x32xf32>
    %c0_18 = arith.constant 0 : index
    %c0_19 = arith.constant 0 : index
    %c0_20 = arith.constant 0 : index
    %74 = vector.load %arg6[%c0_18, %c0_19, %c0_20] : memref<1x1x32xf32, #tpu.memory_space<vmem>>, vector<1x1x32xf32>
    %75 = vector.shape_cast %74 : vector<1x1x32xf32> to vector<1x32xf32>
    %76 = vector.broadcast %75 : vector<1x32xf32> to vector<8x32xf32>
    %77 = arith.addf %73, %76 : vector<8x32xf32>
    %78 = arith.addf %4, %77 : vector<8x32xf32>
    %c0_21 = arith.constant 0 : index
    %c0_22 = arith.constant 0 : index
    %c0_23 = arith.constant 0 : index
    %79 = vector.load %arg11[%c0_21, %c0_22, %c0_23] : memref<1x1x32xf32, #tpu.memory_space<vmem>>, vector<1x1x32xf32>
    %80 = vector.shape_cast %79 : vector<1x1x32xf32> to vector<1x32xf32>
    %c0_24 = arith.constant 0 : index
    %c0_25 = arith.constant 0 : index
    %c0_26 = arith.constant 0 : index
    %81 = vector.load %arg12[%c0_24, %c0_25, %c0_26] : memref<1x1x32xf32, #tpu.memory_space<vmem>>, vector<1x1x32xf32>
    %82 = vector.shape_cast %81 : vector<1x1x32xf32> to vector<1x32xf32>
    %cst_27 = arith.constant dense<0.000000e+00> : vector<8xf32>
    %83 = vector.multi_reduction <add>, %78, %cst_27 [1] : vector<8x32xf32> to vector<8xf32>
    %84 = vector.shape_cast %83 : vector<8xf32> to vector<8x1xf32>
    %cst_28 = arith.constant 3.200000e+01 : f32
    %85 = vector.broadcast %cst_28 : f32 to vector<8x1xf32>
    %86 = arith.divf %84, %85 : vector<8x1xf32>
    %87 = vector.broadcast %86 : vector<8x1xf32> to vector<8x32xf32>
    %88 = arith.subf %78, %87 : vector<8x32xf32>
    %89 = arith.mulf %88, %88 : vector<8x32xf32>
    %cst_29 = arith.constant dense<0.000000e+00> : vector<8xf32>
    %90 = vector.multi_reduction <add>, %89, %cst_29 [1] : vector<8x32xf32> to vector<8xf32>
    %91 = vector.shape_cast %90 : vector<8xf32> to vector<8x1xf32>
    %cst_30 = arith.constant 3.200000e+01 : f32
    %92 = vector.broadcast %cst_30 : f32 to vector<8x1xf32>
    %93 = arith.divf %91, %92 : vector<8x1xf32>
    %94 = vector.broadcast %86 : vector<8x1xf32> to vector<8x32xf32>
    %95 = arith.subf %78, %94 : vector<8x32xf32>
    %cst_31 = arith.constant 9.99999974E-6 : f32
    %96 = vector.broadcast %cst_31 : f32 to vector<8x1xf32>
    %97 = arith.addf %93, %96 : vector<8x1xf32>
    %98 = math.rsqrt %97 : vector<8x1xf32>
    %99 = vector.broadcast %98 : vector<8x1xf32> to vector<8x32xf32>
    %100 = arith.mulf %95, %99 : vector<8x32xf32>
    %101 = vector.broadcast %80 : vector<1x32xf32> to vector<8x32xf32>
    %102 = arith.mulf %100, %101 : vector<8x32xf32>
    %103 = vector.broadcast %82 : vector<1x32xf32> to vector<8x32xf32>
    %104 = arith.addf %102, %103 : vector<8x32xf32>
    %105 = arith.truncf %104 : vector<8x32xf32> to vector<8x32xbf16>
    %cst_32 = arith.constant 0.000000e+00 : f32
    %106 = vector.broadcast %cst_32 : f32 to vector<8x32xf32>
    %c0_33 = arith.constant 0 : index
    %c0_34 = arith.constant 0 : index
    %c0_35 = arith.constant 0 : index
    %107 = vector.load %arg7[%c0_33, %c0_34, %c0_35] : memref<1x32x2048xbf16, #tpu.memory_space<vmem>>, vector<1x32x512xbf16>
    %108 = vector.shape_cast %107 : vector<1x32x512xbf16> to vector<32x512xbf16>
    %c0_36 = arith.constant 0 : index
    %c0_37 = arith.constant 0 : index
    %c0_38 = arith.constant 0 : index
    %109 = vector.load %arg8[%c0_36, %c0_37, %c0_38] : memref<1x1x2048xf32, #tpu.memory_space<vmem>>, vector<1x1x512xf32>
    %110 = vector.shape_cast %109 : vector<1x1x512xf32> to vector<1x512xf32>
    %c0_39 = arith.constant 0 : index
    %c0_40 = arith.constant 0 : index
    %c0_41 = arith.constant 0 : index
    %111 = vector.load %arg9[%c0_39, %c0_40, %c0_41] : memref<1x2048x32xbf16, #tpu.memory_space<vmem>>, vector<1x512x32xbf16>
    %112 = vector.shape_cast %111 : vector<1x512x32xbf16> to vector<512x32xbf16>
    %cst_42 = arith.constant dense<0.000000e+00> : vector<8x512xf32>
    %113 = tpu.matmul %105, %108, %cst_42 {dimension_numbers = #tpu.dot_dimension_numbers<[1], [0], [0], [1], [0, 0, 1, 1], [], []>} : vector<8x32xbf16>, vector<32x512xbf16>, vector<8x512xf32> -> vector<8x512xf32>
    %114 = vector.broadcast %110 : vector<1x512xf32> to vector<8x512xf32>
    %115 = arith.addf %113, %114 : vector<8x512xf32>
    %cst_43 = arith.constant 0.000000e+00 : f32
    %116 = vector.broadcast %cst_43 : f32 to vector<8x512xf32>
    %117 = arith.maximumf %115, %116 : vector<8x512xf32>
    %118 = arith.truncf %117 : vector<8x512xf32> to vector<8x512xbf16>
    %cst_44 = arith.constant dense<0.000000e+00> : vector<8x32xf32>
    %119 = tpu.matmul %118, %112, %cst_44 {dimension_numbers = #tpu.dot_dimension_numbers<[1], [0], [0], [1], [0, 0, 1, 1], [], []>} : vector<8x512xbf16>, vector<512x32xbf16>, vector<8x32xf32> -> vector<8x32xf32>
    %120 = arith.addf %106, %119 : vector<8x32xf32>
    %c0_45 = arith.constant 0 : index
    %c0_46 = arith.constant 0 : index
    %c512 = arith.constant 512 : index
    %121 = vector.load %arg7[%c0_45, %c0_46, %c512] : memref<1x32x2048xbf16, #tpu.memory_space<vmem>>, vector<1x32x512xbf16>
    %122 = vector.shape_cast %121 : vector<1x32x512xbf16> to vector<32x512xbf16>
    %c0_47 = arith.constant 0 : index
    %c0_48 = arith.constant 0 : index
    %c512_49 = arith.constant 512 : index
    %123 = vector.load %arg8[%c0_47, %c0_48, %c512_49] : memref<1x1x2048xf32, #tpu.memory_space<vmem>>, vector<1x1x512xf32>
    %124 = vector.shape_cast %123 : vector<1x1x512xf32> to vector<1x512xf32>
    %c0_50 = arith.constant 0 : index
    %c512_51 = arith.constant 512 : index
    %c0_52 = arith.constant 0 : index
    %125 = vector.load %arg9[%c0_50, %c512_51, %c0_52] : memref<1x2048x32xbf16, #tpu.memory_space<vmem>>, vector<1x512x32xbf16>
    %126 = vector.shape_cast %125 : vector<1x512x32xbf16> to vector<512x32xbf16>
    %cst_53 = arith.constant dense<0.000000e+00> : vector<8x512xf32>
    %127 = tpu.matmul %105, %122, %cst_53 {dimension_numbers = #tpu.dot_dimension_numbers<[1], [0], [0], [1], [0, 0, 1, 1], [], []>} : vector<8x32xbf16>, vector<32x512xbf16>, vector<8x512xf32> -> vector<8x512xf32>
    %128 = vector.broadcast %124 : vector<1x512xf32> to vector<8x512xf32>
    %129 = arith.addf %127, %128 : vector<8x512xf32>
    %cst_54 = arith.constant 0.000000e+00 : f32
    %130 = vector.broadcast %cst_54 : f32 to vector<8x512xf32>
    %131 = arith.maximumf %129, %130 : vector<8x512xf32>
    %132 = arith.truncf %131 : vector<8x512xf32> to vector<8x512xbf16>
    %cst_55 = arith.constant dense<0.000000e+00> : vector<8x32xf32>
    %133 = tpu.matmul %132, %126, %cst_55 {dimension_numbers = #tpu.dot_dimension_numbers<[1], [0], [0], [1], [0, 0, 1, 1], [], []>} : vector<8x512xbf16>, vector<512x32xbf16>, vector<8x32xf32> -> vector<8x32xf32>
    %134 = arith.addf %120, %133 : vector<8x32xf32>
    %c0_56 = arith.constant 0 : index
    %c0_57 = arith.constant 0 : index
    %c1024 = arith.constant 1024 : index
    %135 = vector.load %arg7[%c0_56, %c0_57, %c1024] : memref<1x32x2048xbf16, #tpu.memory_space<vmem>>, vector<1x32x512xbf16>
    %136 = vector.shape_cast %135 : vector<1x32x512xbf16> to vector<32x512xbf16>
    %c0_58 = arith.constant 0 : index
    %c0_59 = arith.constant 0 : index
    %c1024_60 = arith.constant 1024 : index
    %137 = vector.load %arg8[%c0_58, %c0_59, %c1024_60] : memref<1x1x2048xf32, #tpu.memory_space<vmem>>, vector<1x1x512xf32>
    %138 = vector.shape_cast %137 : vector<1x1x512xf32> to vector<1x512xf32>
    %c0_61 = arith.constant 0 : index
    %c1024_62 = arith.constant 1024 : index
    %c0_63 = arith.constant 0 : index
    %139 = vector.load %arg9[%c0_61, %c1024_62, %c0_63] : memref<1x2048x32xbf16, #tpu.memory_space<vmem>>, vector<1x512x32xbf16>
    %140 = vector.shape_cast %139 : vector<1x512x32xbf16> to vector<512x32xbf16>
    %cst_64 = arith.constant dense<0.000000e+00> : vector<8x512xf32>
    %141 = tpu.matmul %105, %136, %cst_64 {dimension_numbers = #tpu.dot_dimension_numbers<[1], [0], [0], [1], [0, 0, 1, 1], [], []>} : vector<8x32xbf16>, vector<32x512xbf16>, vector<8x512xf32> -> vector<8x512xf32>
    %142 = vector.broadcast %138 : vector<1x512xf32> to vector<8x512xf32>
    %143 = arith.addf %141, %142 : vector<8x512xf32>
    %cst_65 = arith.constant 0.000000e+00 : f32
    %144 = vector.broadcast %cst_65 : f32 to vector<8x512xf32>
    %145 = arith.maximumf %143, %144 : vector<8x512xf32>
    %146 = arith.truncf %145 : vector<8x512xf32> to vector<8x512xbf16>
    %cst_66 = arith.constant dense<0.000000e+00> : vector<8x32xf32>
    %147 = tpu.matmul %146, %140, %cst_66 {dimension_numbers = #tpu.dot_dimension_numbers<[1], [0], [0], [1], [0, 0, 1, 1], [], []>} : vector<8x512xbf16>, vector<512x32xbf16>, vector<8x32xf32> -> vector<8x32xf32>
    %148 = arith.addf %134, %147 : vector<8x32xf32>
    %c0_67 = arith.constant 0 : index
    %c0_68 = arith.constant 0 : index
    %c1536 = arith.constant 1536 : index
    %149 = vector.load %arg7[%c0_67, %c0_68, %c1536] : memref<1x32x2048xbf16, #tpu.memory_space<vmem>>, vector<1x32x512xbf16>
    %150 = vector.shape_cast %149 : vector<1x32x512xbf16> to vector<32x512xbf16>
    %c0_69 = arith.constant 0 : index
    %c0_70 = arith.constant 0 : index
    %c1536_71 = arith.constant 1536 : index
    %151 = vector.load %arg8[%c0_69, %c0_70, %c1536_71] : memref<1x1x2048xf32, #tpu.memory_space<vmem>>, vector<1x1x512xf32>
    %152 = vector.shape_cast %151 : vector<1x1x512xf32> to vector<1x512xf32>
    %c0_72 = arith.constant 0 : index
    %c1536_73 = arith.constant 1536 : index
    %c0_74 = arith.constant 0 : index
    %153 = vector.load %arg9[%c0_72, %c1536_73, %c0_74] : memref<1x2048x32xbf16, #tpu.memory_space<vmem>>, vector<1x512x32xbf16>
    %154 = vector.shape_cast %153 : vector<1x512x32xbf16> to vector<512x32xbf16>
    %cst_75 = arith.constant dense<0.000000e+00> : vector<8x512xf32>
    %155 = tpu.matmul %105, %150, %cst_75 {dimension_numbers = #tpu.dot_dimension_numbers<[1], [0], [0], [1], [0, 0, 1, 1], [], []>} : vector<8x32xbf16>, vector<32x512xbf16>, vector<8x512xf32> -> vector<8x512xf32>
    %156 = vector.broadcast %152 : vector<1x512xf32> to vector<8x512xf32>
    %157 = arith.addf %155, %156 : vector<8x512xf32>
    %cst_76 = arith.constant 0.000000e+00 : f32
    %158 = vector.broadcast %cst_76 : f32 to vector<8x512xf32>
    %159 = arith.maximumf %157, %158 : vector<8x512xf32>
    %160 = arith.truncf %159 : vector<8x512xf32> to vector<8x512xbf16>
    %cst_77 = arith.constant dense<0.000000e+00> : vector<8x32xf32>
    %161 = tpu.matmul %160, %154, %cst_77 {dimension_numbers = #tpu.dot_dimension_numbers<[1], [0], [0], [1], [0, 0, 1, 1], [], []>} : vector<8x512xbf16>, vector<512x32xbf16>, vector<8x32xf32> -> vector<8x32xf32>
    %162 = arith.addf %148, %161 : vector<8x32xf32>
    %c0_78 = arith.constant 0 : index
    %c0_79 = arith.constant 0 : index
    %c0_80 = arith.constant 0 : index
    %163 = vector.load %arg10[%c0_78, %c0_79, %c0_80] : memref<1x1x32xf32, #tpu.memory_space<vmem>>, vector<1x1x32xf32>
    %164 = vector.shape_cast %163 : vector<1x1x32xf32> to vector<1x32xf32>
    %165 = vector.broadcast %164 : vector<1x32xf32> to vector<8x32xf32>
    %166 = arith.addf %162, %165 : vector<8x32xf32>
    %167 = arith.addf %104, %166 : vector<8x32xf32>
    %c0_81 = arith.constant 0 : index
    %c0_82 = arith.constant 0 : index
    %c0_83 = arith.constant 0 : index
    %168 = vector.load %arg13[%c0_81, %c0_82, %c0_83] : memref<1x1x32xf32, #tpu.memory_space<vmem>>, vector<1x1x32xf32>
    %169 = vector.shape_cast %168 : vector<1x1x32xf32> to vector<1x32xf32>
    %c0_84 = arith.constant 0 : index
    %c0_85 = arith.constant 0 : index
    %c0_86 = arith.constant 0 : index
    %170 = vector.load %arg14[%c0_84, %c0_85, %c0_86] : memref<1x1x32xf32, #tpu.memory_space<vmem>>, vector<1x1x32xf32>
    %171 = vector.shape_cast %170 : vector<1x1x32xf32> to vector<1x32xf32>
    %cst_87 = arith.constant dense<0.000000e+00> : vector<8xf32>
    %172 = vector.multi_reduction <add>, %167, %cst_87 [1] : vector<8x32xf32> to vector<8xf32>
    %173 = vector.shape_cast %172 : vector<8xf32> to vector<8x1xf32>
    %cst_88 = arith.constant 3.200000e+01 : f32
    %174 = vector.broadcast %cst_88 : f32 to vector<8x1xf32>
    %175 = arith.divf %173, %174 : vector<8x1xf32>
    %176 = vector.broadcast %175 : vector<8x1xf32> to vector<8x32xf32>
    %177 = arith.subf %167, %176 : vector<8x32xf32>
    %178 = arith.mulf %177, %177 : vector<8x32xf32>
    %cst_89 = arith.constant dense<0.000000e+00> : vector<8xf32>
    %179 = vector.multi_reduction <add>, %178, %cst_89 [1] : vector<8x32xf32> to vector<8xf32>
    %180 = vector.shape_cast %179 : vector<8xf32> to vector<8x1xf32>
    %cst_90 = arith.constant 3.200000e+01 : f32
    %181 = vector.broadcast %cst_90 : f32 to vector<8x1xf32>
    %182 = arith.divf %180, %181 : vector<8x1xf32>
    %183 = vector.broadcast %175 : vector<8x1xf32> to vector<8x32xf32>
    %184 = arith.subf %167, %183 : vector<8x32xf32>
    %cst_91 = arith.constant 9.99999974E-6 : f32
    %185 = vector.broadcast %cst_91 : f32 to vector<8x1xf32>
    %186 = arith.addf %182, %185 : vector<8x1xf32>
    %187 = math.rsqrt %186 : vector<8x1xf32>
    %188 = vector.broadcast %187 : vector<8x1xf32> to vector<8x32xf32>
    %189 = arith.mulf %184, %188 : vector<8x32xf32>
    %190 = vector.broadcast %169 : vector<1x32xf32> to vector<8x32xf32>
    %191 = arith.mulf %189, %190 : vector<8x32xf32>
    %192 = vector.broadcast %171 : vector<1x32xf32> to vector<8x32xf32>
    %193 = arith.addf %191, %192 : vector<8x32xf32>
    %c0_92 = arith.constant 0 : index
    %c0_93 = arith.constant 0 : index
    %c0_94 = arith.constant 0 : index
    %194 = vector.load %arg15[%c0_92, %c0_93, %c0_94] : memref<1x8x32xf32, #tpu.memory_space<vmem>>, vector<1x8x32xf32>
    %195 = vector.shape_cast %194 : vector<1x8x32xf32> to vector<8x32xf32>
    %196 = vector.shape_cast %193 : vector<8x32xf32> to vector<1x8x32xf32>
    tpu.vector_store %arg15[%c0_92, %c0_93, %c0_94], %196 {strides = array<i32>} : memref<1x8x32xf32, #tpu.memory_space<vmem>>, vector<1x8x32xf32>,
    return
  }
  func.func @transform_0(%arg0: i32, %arg1: i32) -> (i32, i32, i32) {
    %c0_i32 = arith.constant 0 : i32
    %c0_i32_0 = arith.constant 0 : i32
    %c0_i32_1 = arith.constant 0 : i32
    return %arg0, %c0_i32, %c0_i32_0 : i32, i32, i32
  }
  func.func @transform_1(%arg0: i32, %arg1: i32) -> (i32, i32, i32) {
    %c0_i32 = arith.constant 0 : i32
    %c0_i32_0 = arith.constant 0 : i32
    %c0_i32_1 = arith.constant 0 : i32
    return %arg1, %c0_i32, %c0_i32_0 : i32, i32, i32
  }
  func.func @transform_2(%arg0: i32, %arg1: i32) -> (i32, i32, i32) {
    %c0_i32 = arith.constant 0 : i32
    %c0_i32_0 = arith.constant 0 : i32
    %c0_i32_1 = arith.constant 0 : i32
    return %arg1, %c0_i32, %c0_i32_0 : i32, i32, i32
  }
  func.func @transform_3(%arg0: i32, %arg1: i32) -> (i32, i32, i32) {
    %c0_i32 = arith.constant 0 : i32
    %c0_i32_0 = arith.constant 0 : i32
    %c0_i32_1 = arith.constant 0 : i32
    return %arg1, %c0_i32, %c0_i32_0 : i32, i32, i32
  }
  func.func @transform_4(%arg0: i32, %arg1: i32) -> (i32, i32, i32) {
    %c0_i32 = arith.constant 0 : i32
    %c0_i32_0 = arith.constant 0 : i32
    %c0_i32_1 = arith.constant 0 : i32
    return %arg1, %c0_i32, %c0_i32_0 : i32, i32, i32
  }
  func.func @transform_5(%arg0: i32, %arg1: i32) -> (i32, i32, i32) {
    %c0_i32 = arith.constant 0 : i32
    %c0_i32_0 = arith.constant 0 : i32
    %c0_i32_1 = arith.constant 0 : i32
    return %arg1, %c0_i32, %c0_i32_0 : i32, i32, i32
  }
  func.func @transform_6(%arg0: i32, %arg1: i32) -> (i32, i32, i32) {
    %c0_i32 = arith.constant 0 : i32
    %c0_i32_0 = arith.constant 0 : i32
    %c0_i32_1 = arith.constant 0 : i32
    return %arg1, %c0_i32, %c0_i32_0 : i32, i32, i32
  }
  func.func @transform_7(%arg0: i32, %arg1: i32) -> (i32, i32, i32) {
    %c0_i32 = arith.constant 0 : i32
    %c0_i32_0 = arith.constant 0 : i32
    %c0_i32_1 = arith.constant 0 : i32
    return %arg1, %c0_i32, %c0_i32_0 : i32, i32, i32
  }
  func.func @transform_8(%arg0: i32, %arg1: i32) -> (i32, i32, i32) {
    %c0_i32 = arith.constant 0 : i32
    %c0_i32_0 = arith.constant 0 : i32
    %c0_i32_1 = arith.constant 0 : i32
    return %arg1, %c0_i32, %c0_i32_0 : i32, i32, i32
  }
  func.func @transform_9(%arg0: i32, %arg1: i32) -> (i32, i32, i32) {
    %c0_i32 = arith.constant 0 : i32
    %c0_i32_0 = arith.constant 0 : i32
    %c0_i32_1 = arith.constant 0 : i32
    return %arg1, %c0_i32, %c0_i32_0 : i32, i32, i32
  }
  func.func @transform_10(%arg0: i32, %arg1: i32) -> (i32, i32, i32) {
    %c0_i32 = arith.constant 0 : i32
    %c0_i32_0 = arith.constant 0 : i32
    %c0_i32_1 = arith.constant 0 : i32
    return %arg1, %c0_i32, %c0_i32_0 : i32, i32, i32
  }
  func.func @transform_11(%arg0: i32, %arg1: i32) -> (i32, i32, i32) {
    %c0_i32 = arith.constant 0 : i32
    %c0_i32_0 = arith.constant 0 : i32
    %c0_i32_1 = arith.constant 0 : i32
    return %arg1, %c0_i32, %c0_i32_0 : i32, i32, i32
  }
  func.func @transform_12(%arg0: i32, %arg1: i32) -> (i32, i32, i32) {
    %c0_i32 = arith.constant 0 : i32
    %c0_i32_0 = arith.constant 0 : i32
    %c0_i32_1 = arith.constant 0 : i32
    return %arg1, %c0_i32, %c0_i32_0 : i32, i32, i32
  }
  func.func @transform_13(%arg0: i32, %arg1: i32) -> (i32, i32, i32) {
    %c0_i32 = arith.constant 0 : i32
    %c0_i32_0 = arith.constant 0 : i32
    %c0_i32_1 = arith.constant 0 : i32
    return %arg0, %c0_i32, %c0_i32_0 : i32, i32, i32
  }
}

</mosaic_0001>

<bundles_post_ra>
// kernel: tpu_custom_call.1
= control target key start
LH: loop header
LB: loop body
LE: loop exit
PB: predicated region body
PF: predicated region fallthrough
CT: control target
= control target key end

     0   :  { %s5003_s0 = inlined_call_operand.vmem [shape: f32[2,8,32], index: 0, kind: input, shape index: {}]   ;;  %s5004_s1 = inlined_call_operand.vmem [shape: bf16[2,32,96], index: 1, kind: input, shape index: {}]   ;;  %s5005_s2 = inlined_call_operand.vmem [shape: f32[2,1,96], index: 2, kind: input, shape index: {}]   ;;  %s5006_s3 = inlined_call_operand.vmem [shape: bf16[2,32,32], index: 3, kind: input, shape index: {}]   ;;  %s5007_s4 = inlined_call_operand.vmem [shape: f32[2,1,32], index: 4, kind: input, shape index: {}]   ;;  %s5008_s5 = inlined_call_operand.vmem [shape: bf16[2,32,2048], index: 5, kind: input, shape index: {}]   ;;  %s5009_s6 = inlined_call_operand.vmem [shape: f32[2,1,2048], index: 6, kind: input, shape index: {}]   ;;  %s5010_s7 = inlined_call_operand.vmem [shape: bf16[2,2048,32], index: 7, kind: input, shape index: {}]   ;;  %s5011_s8 = inlined_call_operand.vmem [shape: f32[2,1,32], index: 8, kind: input, shape index: {}]   ;;  %s5012_s9 = inlined_call_operand.vmem [shape: f32[2,1,32], index: 9, kind: input, shape index: {}]   ;;  %s5013_s10 = inlined_call_operand.vmem [shape: f32[2,1,32], index: 10, kind: input, shape index: {}]   ;;  %s5014_s11 = inlined_call_operand.vmem [shape: f32[2,1,32], index: 11, kind: input, shape index: {}]   ;;  %s5015_s12 = inlined_call_operand.vmem [shape: f32[2,1,32], index: 12, kind: input, shape index: {}]   ;;  %s5016_s13 = inlined_call_operand.hbm [shape: f32[2,8,32], index: 13, kind: output, shape index: {}]  }
   0x1   :  { %5032 = sst [smem:[#allocation18_spill]] %s5003_s0 }
   0x2   :  { %5033 = sst [smem:[#allocation19_spill]] %s5004_s1 }
   0x3   :  { %5034 = sst [smem:[#allocation20_spill]] %s5006_s3 }
   0x4   :  { %5035 = sst [smem:[#allocation21_spill]] %s5008_s5 }
   0x5   :  { %5036 = sst [smem:[#allocation22_spill]] %s5009_s6 }
   0x6   :  { %5037 = sst [smem:[#allocation23_spill]] %s5010_s7 }
   0x7   :  { %5038 = sst [smem:[#allocation24_spill]] %s5015_s12 }
   0x8   :  { %5039 = sst [smem:[#allocation25_spill]] %s5016_s13 }
   0x9   :  { %18 = vsyncpa [#allocation3], 0 }
   0xa   :  { %20 = vsyncpa [#allocation3 + $0x1], 0  ;;  %s4426_s25 = smov 0   ;;  %s4428_s26 = smov 0  }
   0xb   :  { %s4430_s27 = smov 0   ;;  %s4432_s28 = smov 0  }
   0xc   :  { %s4434_s29 = smov 0   ;;  %s4436_s30 = smov 0  }
   0xd   :  { %s4438_s14 = smov 0   ;;  %s4440_s15 = smov 0  }
   0xe LB: > { %5040 = sst [smem:[#allocation5_spill]] %s4314_s25  ;;  %s3538_s16 = sadd.s32 4294967295, %s4342_s15   ;;  %s4342_s15 = sphi %s4440_s15, %s26_s15   ;;  %s4338_s14 = sphi %s4438_s14, %s5081_s14   ;;  %s4334_s30 = sphi %s4436_s30, %s5080_s30   ;;  %s4330_s29 = sphi %s4434_s29, %s5079_s29   ;;  %s4326_s28 = sphi %s4432_s28, %s5078_s28   ;;  %s4322_s27 = sphi %s4430_s27, %s5077_s27   ;;  %s4318_s26 = sphi %s4428_s26, %s5076_s26   ;;  %s4314_s25 = sphi %s4426_s25, %s5075_s25  }
   0xf   : > { %5041 = sst [smem:[#allocation6_spill]] %s4318_s26  ;;  %s3539_s17 = sadd.s32 4294967294, %s4342_s15  }
  0x10   : > { %5042 = sst [smem:[#allocation7_spill]] %s4322_s27  ;;  %s35_s18 = sadd.s32 1, %s4334_s30 }
  0x11   : > { %5043 = sst [smem:[#allocation8_spill]] %s4326_s28  ;;  %p36_p0 = scmp.ge.s32.totalorder %s35_s18, 2 }
  0x12   : > { %5044 = sst [smem:[#allocation9_spill]] %s4330_s29  ;;  %s38_s19 = sadd.s32 1, %s4338_s14 }
  0x13   : > { %5045 = sst [smem:[#allocation10_spill]] %s4334_s30  ;;  %p393_p1 = scmp.ne.s32.totalorder %s4322_s27, %s4318_s26 }
  0x14   : > { %5046 = sst [smem:[#allocation11_spill]] %s4338_s14  ;;  %p394_p2 = scmp.eq.s32.totalorder %s3538_s16, 3 }
  0x15   : > { %5047 = sst [smem:[#allocation12_spill]] %s4342_s15  ;;  %s5083_s18 = smov (%p36_p0, %s35_s18), 0 }
  0x16   : > { %5048 = sst [smem:[#allocation13_spill]] %s5083_s18  ;;  %s5085_s19 = smov (!%p36_p0, %s38_s19), %s4338_s14 }
  0x17   : > { %p4475_p3 = por %p394_p2, %p393_p1  ;;  %p399_p4 = scmp.ne.s32.totalorder %s4318_s26, %s4314_s25 }
  0x18   : > { %p40_p5 = scmp.ge.s32.totalorder %s5085_s19, 2  ;;  %p400_p6 = scmp.eq.s32.totalorder %s3539_s17, 3 }
  0x19   : > { %s5049_s20 = scalar_select %p4475_p3, 1, 0 }
  0x1a   : > { %p3542_p7 = scmp.ge.s32.totalorder %s4342_s15, 1  ;;  %p506_p8 = scmp.lt.s32.totalorder %s4342_s15, 5 }
  0x1b   : > { %5050 = sst [smem:[#allocation14_spill]] %s5049_s20  ;;  %s5087_s19 = smov (%p40_p5, %s5085_s19), 0 }
  0x1c   : > { %5051 = sst [smem:[#allocation15_spill]] %s5087_s19  ;;  %p4485_p9 = por %p400_p6, %p399_p4 }
  0x1d   : > { %p507_p10 = pnand %p3542_p7, %p506_p8  ;;  %s380_s22 = ssub.s32 %s4338_s14, %s5087_s19 }
  0x1e   : > { %s5052_s21 = scalar_select %p4485_p9, 1, 0 }
  0x1f   : > { %s383_s23 = sadd.s32 1, %s4322_s27  ;;  %p381_p11 = scmp.eq.s32.totalorder %s380_s22, 0 }
  0x20   : > { %5053 = sst [smem:[#allocation16_spill]] %s5052_s21  ;;  %510 = sbr.rel (%p507_p10) target bundleno = 3191 (0xc77), region = 72 }
  0x21   : > { %s4493_s24 = scalar_select %p381_p11, %s4322_s27, %s383_s23  }
  0x22   : > { %s5020_s16 = sand.u32 (!%p507_p10), 1, %s4318_s26   ;;  %p594_p12 = scmp.lt.s32.totalorder (!%p507_p10), %s4330_s29, 1 }
  0x23   : > { %5054 = sst [smem:[#allocation17_spill]] %s4493_s24  ;;  %s3543_s17 = sshll.u32 (!%p507_p10), %s5020_s16, 3 }
  0x24   : > { %p598_p13 = scmp.lt.s32.totalorder (!%p507_p10), %s4326_s28, 1  ;;  %s5055_s0 = sld [smem:[#allocation18_spill]] (!%p507_p10) }
  0x25   : > { %s5056_s1 = sld [smem:[#allocation19_spill]] (!%p507_p10)  ;;  %s5057_s3 = sld [smem:[#allocation20_spill]] (!%p507_p10) }
  0x26   : > { %s5058_s6 = sld [smem:[#allocation22_spill]] (!%p507_p10)  ;;  %s5059_s5 = sld [smem:[#allocation21_spill]] (!%p507_p10) }
  0x27   : > { %s595_s18 = scalar_select %p594_p12, %s4330_s29, 1 }
  0x28   : > { %s4502_s30 = scalar_select %p598_p13, %s4326_s28, 1 }
  0x29   : > { %s3544_s22 = sshll.u32 %s595_s18, 3  ;;  %s5060_s7 = sld [smem:[#allocation23_spill]] }
  0x2a   : > { %s597_s14 = scalar_lea.vmem %s5055_s0, %s3544_s22  ;;  %s3748_s16 = sshll.u32 %s4502_s30, 4 }
  0x2b   : > { %s602_s21 = scalar_lea.vmem %s5056_s1, %s3748_s16  ;;  %s4518_s29 = scalar_lea.vmem %s5057_s3, %s3748_s16 }
  0x2c   : > { %s3750_s23 = sshll.u32 %s4502_s30, 8  ;;  %s4528_s12 = scalar_lea.vmem %s5058_s6, %s3748_s16 }
  0x2d   : > { %s4533_s25 = scalar_lea.vmem %s5059_s5, %s3750_s23  ;;  %s3751_s15 = sshll.u32 %s4502_s30, 10 }
  0x2e   : > { %s630_s18 = scalar_lea.vmem %s5011_s8, %s4502_s30  ;;  %s633_s0 = scalar_lea.vmem %s5012_s9, %s4502_s30 }
  0x2f   : > { %s4539_s20 = scalar_lea.vmem %s5060_s7, %s3751_s15  ;;  %s636_s27 = scalar_lea.vmem %s5013_s10, %s4502_s30 }
  0x30   : > { %s639_s5 = scalar_lea.vmem %s5014_s11, %s4502_s30  ;;  %s5061_s15 = sld [smem:[#allocation24_spill]] }
  0x31   : > { %s4561_s7 = scalar_lea.vmem [#allocation2], %s3543_s17  ;;  %s5062_s1 = sld [smem:[#allocation8_spill]] }
  0x36   : > { %s642_s26 = scalar_lea.vmem %s5061_s15, %s4502_s30 }
  0x37   : > { %p3554_p0 = scmp.ne.s32.totalorder %s5062_s1, 0 }
  0x38   : > { %v648_v0 = vld [vmem:[%s597_s14] sm:$0xff] (!%p3554_p0)  ;;  %vm649_vm0 = vcmask (!%p3554_p0), 261120  }
  0x39   : > { %647 = sbr.rel (%p3554_p0) target bundleno = 64 (0x40), region = 76  ;;  %650 = vst.msk [vmem:[%s4561_s7] sm:$0xff] (!%p3554_p0), %vm649_vm0, %v648_v0 }
  0x40 PF: > { %v4096_v1 = vld [vmem:[%s602_s21] sm:$0xff]   ;;  %v4344_v2 = vmov 0.0   ;;  %v4097_v3 = vld [vmem:[%s602_s21 + $0x8] sm:$0xff]   ;;  %vm4345_vm1 = vmmov 0   ;;  %vm676_vm2 = vcmask 261120   ;;  %s5063_s14 = scalar_lea.vmem %s5005_s2, %s4502_s30  ;;  %s4346_s21 = smov 104  }
  0x41   : > { %3950 = vmatprep.subr.bf16.mxu0 %v4344_v2  ;;  %3958 = vmatprep.subr.bf16.mxu1 %v4344_v2  ;;  %v4570_v4 = vld [vmem:[%s4561_s7] sm:$0xff]  ;;  %s4347_s17 = smov 120   ;;  %s4348_s19 = smov 112   ;;  %vm752_vm3 = vcmask 64512   ;;  %vm999_vm4 = vcmask 1043456   ;;  %vm1200_vm5 = vcmask 130048  }
  0x42   : > { %3951 = vmatpush3.bf16.msra.mxu0 %v4096_v1  ;;  %3954 = vmatprep.mubr.msk.bf16.mxu0 %vm4345_vm1, %v4344_v2  ;;  %v652_v5 = vpack.c.bf16 %v4570_v4, %v4570_v4  ;;  %v3555_v6 = vld [vmem:[%s5063_s14] ss:$0 sm:$0xff]  ;;  %s4349_s28 = smov 96   ;;  %s4350_s16 = smov 64   ;;  %vm1202_vm6 = vcmask 195584  }
  0x43   : > { %3952 = vmatprep.subr.bf16.mxu0 %v4344_v2  ;;  %3960 = vmatprep.mubr.msk.bf16.mxu1 %vm4345_vm1, %v4344_v2  ;;  %s4351_s22 = smov 8   ;;  %s4352_s23 = smov 16  }
  0x44   : > { %s4353_s24 = smov 24   ;;  %s5064_s15 = scalar_lea.vmem %s5007_s4, %s4502_s30 }
  0x46   : > { %3953 = vmatpush3.bf16.msra.mxu0 %v4097_v3 }
  0x47   : > { %3964 = vmatprep.subr.bf16.mxu0 %v4344_v2 }
  0x49   : > { %3955 = vmatmul.mubr.msk.bf16.vlgmr.msra.gmra.mrb[0].mxu0 %vm676_vm2, %v652_v5 }
  0x4a   : > { %3966 = vmatprep.mubr.msk.bf16.mxu0 %vm4345_vm1, %v4344_v2 }
 0x11c   : > { %v714_v7 = vpop.f32.mrb[0].mxu0 }
 0x11d   : > { %v715_v8 = vadd.f32 %v3555_v6, %v714_v7  ;;  %v3956_v9 = vpop.f32.mrb[1].mxu0 }
 0x11e   : > { %v717_v10 = vpop.f32.mrb[2].mxu0 }
 0x11f   : > { %742 = vrot.lane.b32.xlu1 %v715_v8, %s4346_s21  ;;  %736 = vrot.lane.b32.xlu0 %v715_v8, %s4347_s17  ;;  %v3957_v11 = vpop.f32.mrb[3].mxu0  ;;  %v4586_v12 = vpack.c.bf16 %v715_v8, %v715_v8  ;;  %v720_v13 = vmul.f32 0.35355338, %v715_v8 }
 0x121   : > { %v731_v22 = vpack.c.bf16 %v720_v13, %v720_v13 }
 0x123   : > { %739 = vrot.lane.b32.xlu0 %v715_v8, %s4348_s19  ;;  %750 = vrot.lane.b32.xlu1 %v4586_v12, %s4349_s28 }
 0x127   : > { %722 = vrot.lane.b32.xlu1 %v720_v13, %s4347_s17 }
 0x191   : > { %v743_v14 = vpop.permute.xlu1 %742  ;;  %v737_v15 = vpop.permute.xlu0 %736 }
 0x192   : > { %v4589_v16 = vpack.c.bf16 %v743_v14, %v743_v14  ;;  %v4591_v17 = vpack.c.bf16 %v737_v15, %v737_v15 }
 0x194   : > { %800 = vrot.lane.b32.xlu0 %v4591_v17, %s4349_s28  ;;  %898 = vrot.lane.b32.xlu1 %v4589_v16, %s4349_s28 }
 0x195   : > { %v740_v18 = vpop.permute.xlu0 %739  ;;  %v751_v19 = vpop.permute.xlu1 %750 }
 0x196   : > { %v4595_v20 = vpack.c.bf16 %v740_v18, %v740_v18  ;;  %v757_v21 = vsel %vm752_vm3, %v751_v19, 0 }
 0x197   : > { %3959 = vmatpush3.bf16.xpose.msra.mxu1 %v757_v21 }
 0x198   : > { %849 = vrot.lane.b32.xlu0 %v4595_v20, %s4349_s28  ;;  %728 = vrot.lane.b32.xlu1 %v720_v13, %s4346_s21 }
 0x199   : > { %3970 = vmatprep.subr.bf16.mxu1 %v4344_v2  ;;  %v723_v25 = vpop.permute.xlu1 %722 }
 0x19a   : > { %v732_v29 = vpack.c.bf16 %v723_v25, %v723_v25 }
 0x19c   : > { %725 = vrot.lane.b32.xlu0 %v720_v13, %s4348_s19 }
 0x19e   : > { %3961 = vmatmul.mubr.msk.bf16.vlgmr.msra.gmra.mrb[0].mxu1 %vm752_vm3, %v731_v22 }
 0x19f   : > { %3972 = vmatprep.mubr.msk.bf16.mxu1 %vm4345_vm1, %v4344_v2 }
 0x206   : > { %v801_v23 = vpop.permute.xlu0 %800  ;;  %v899_v28 = vpop.permute.xlu1 %898 }
 0x207   : > { %v806_v24 = vsel %vm752_vm3, %v801_v23, 0  ;;  %v904_v31 = vsel %vm752_vm3, %v899_v28, 0 }
 0x208   : > { %3965 = vmatpush3.bf16.xpose.msra.mxu0 %v806_v24 }
 0x209   : > { %3976 = vmatprep.subr.bf16.mxu0 %v4344_v2 }
 0x20a   : > { %v850_v26 = vpop.permute.xlu0 %849  ;;  %v729_v33 = vpop.permute.xlu1 %728 }
 0x20b   : > { %v855_v27 = vsel %vm752_vm3, %v850_v26, 0  ;;  %v734_v34 = vpack.c.bf16 %v729_v33, %v729_v33 }
 0x20c   : > { %3971 = vmatpush3.bf16.xpose.msra.mxu1 %v855_v27 }
 0x20d   : > { %3982 = vmatprep.subr.bf16.mxu1 %v4344_v2 }
 0x20e   : > { %v726_v30 = vpop.permute.xlu0 %725 }
 0x20f   : > { %3967 = vmatmul.mubr.msk.bf16.vlgmr.msra.gmra.mrb[4].mxu0 %vm752_vm3, %v732_v29  ;;  %v733_v32 = vpack.c.bf16 %v726_v30, %v726_v30 }
 0x210   : > { %3977 = vmatpush3.bf16.xpose.msra.mxu0 %v904_v31  ;;  %3978 = vmatprep.mubr.msk.bf16.mxu0 %vm4345_vm1, %v4344_v2 }
 0x211   : > { %3988 = vmatprep.subr.bf16.mxu0 %v4344_v2 }
 0x213   : > { %3973 = vmatmul.mubr.msk.bf16.vlgmr.msra.gmra.mrb[4].mxu1 %vm752_vm3, %v733_v32 }
 0x214   : > { %3984 = vmatprep.mubr.msk.bf16.mxu1 %vm4345_vm1, %v4344_v2 }
 0x217   : > { %3979 = vmatmul.mubr.msk.bf16.vlgmr.msra.gmra.mrb[8].mxu0 %vm752_vm3, %v734_v34 }
 0x218   : > { %3990 = vmatprep.mubr.msk.bf16.mxu0 %vm4345_vm1, %v4344_v2 }
 0x271   : > { %v793_v35 = vpop.f32.mrb[0].mxu1 }
 0x272   : > { %v3962_v36 = vpop.f32.mrb[1].mxu1  ;;  %v946_v37 = vsel %vm752_vm3, %v793_v35, -inf }
 0x273   : > { %947 = vmax.xlane.f32.xlu0 %v946_v37  ;;  %v796_v38 = vpop.f32.mrb[2].mxu1 }
 0x274   : > { %v3963_v39 = vpop.f32.mrb[3].mxu1 }
 0x2e2   : > { %v842_v40 = vpop.f32.mrb[4].mxu0 }
 0x2e3   : > { %v3968_v41 = vpop.f32.mrb[5].mxu0  ;;  %v949_v42 = vsel %vm752_vm3, %v842_v40, -inf }
 0x2e4   : > { %950 = vmax.xlane.f32.xlu1 %v949_v42  ;;  %v845_v43 = vpop.f32.mrb[6].mxu0  ;;  %v4098_v41 = vld [vmem:[%s4518_s29] sm:$0xff]   ;;  %v4099_v42 = vld [vmem:[%s4518_s29 + $0x8] sm:$0xff]   ;;  %s5069_s29 = sld [smem:[#allocation25_spill]] }
 0x2e5   : > { %v3969_v44 = vpop.f32.mrb[7].mxu0 }
 0x2e6   : > { %v891_v45 = vpop.f32.mrb[4].mxu1 }
 0x2e7   : > { %v3974_v46 = vpop.f32.mrb[5].mxu1  ;;  %v952_v47 = vsel %vm752_vm3, %v891_v45, -inf }
 0x2e8   : > { %953 = vmax.xlane.f32.xlu0 %v952_v47  ;;  %v894_v48 = vpop.f32.mrb[6].mxu1 }
 0x2e9   : > { %v3975_v49 = vpop.f32.mrb[7].mxu1 }
 0x2ea   : > { %v940_v50 = vpop.f32.mrb[8].mxu0  ;;  %s5070_s13 = smov %s5069_s29 }
 0x2eb   : > { %v3980_v51 = vpop.f32.mrb[9].mxu0  ;;  %v955_v52 = vsel %vm752_vm3, %v940_v50, -inf }
 0x2ec   : > { %956 = vmax.xlane.f32.xlu0 %v955_v52  ;;  %v943_v53 = vpop.f32.mrb[10].mxu0 }
 0x2ed   : > { %v3981_v54 = vpop.f32.mrb[11].mxu0 }
 0x2f5   : > { %994 = vrot.lane.b32.xlu1 %v4586_v12, %s4350_s16 }
 0x300   : > { %v948_v55 = vpop.xlane.xlu0 %947 }
 0x301   : > { %v958_v56 = vsub.f32 %v793_v35, %v948_v55 }
 0x303   : > { %v962_v57 = vmul.f32 1.442695, %v958_v56 }
 0x305   : > { %4228 = vpow2.f32 %v962_v57 }
 0x30f   : > { %v4229_v58 = vpop.eup %4228 }
 0x310   : > { %v970_v59 = vsel %vm752_vm3, %v4229_v58, 0.0 }
 0x319   : > { %971 = vadd.xlane.f32.xlu1 %v970_v59 }
 0x371   : > { %v951_v60 = vpop.xlane.xlu1 %950 }
 0x372   : > { %v959_v61 = vsub.f32 %v842_v40, %v951_v60 }
 0x374   : > { %v964_v62 = vmul.f32 1.442695, %v959_v61  ;;  %v3567_v61 = vld [vmem:[%s5064_s15] ss:$0 sm:$0xff] }
 0x375   : > { %v954_v63 = vpop.xlane.xlu0 %953  ;;  %v995_v0 = vpop.permute.xlu1 %994 }
 0x376   : > { %4230 = vpow2.f32 %v964_v62  ;;  %v960_v1 = vsub.f32 %v891_v45, %v954_v63  ;;  %v1001_v3 = vsel %vm999_vm4, %v995_v0, 0 }
 0x377   : > { %3983 = vmatpush3.bf16.msra.mxu1 %v1001_v3 }
 0x378   : > { %v966_v5 = vmul.f32 1.442695, %v960_v1  ;;  %3994 = vmatprep.subr.bf16.mxu1 %v4344_v2 }
 0x379   : > { %v957_v6 = vpop.xlane.xlu0 %956 }
 0x37a   : > { %4232 = vpow2.f32 %v966_v5  ;;  %v961_v7 = vsub.f32 %v940_v50, %v957_v6 }
 0x37c   : > { %v968_v8 = vmul.f32 1.442695, %v961_v7 }
 0x37e   : > { %4234 = vpow2.f32 %v968_v8 }
 0x380   : > { %v4231_v9 = vpop.eup %4230 }
 0x381   : > { %v973_v10 = vsel %vm752_vm3, %v4231_v9, 0.0 }
 0x382   : > { %974 = vadd.xlane.f32.xlu0 %v973_v10 }
 0x384   : > { %v4233_v11 = vpop.eup %4232 }
 0x385   : > { %v976_v12 = vsel %vm752_vm3, %v4233_v11, 0.0 }
 0x386   : > { %977 = vadd.xlane.f32.xlu1 %v976_v12  ;;  %v1303_v12 = vld [vmem:[%s4533_s25] sm:$0xff] }
 0x388   : > { %v4235_v13 = vpop.eup %4234 }
 0x389   : > { %v979_v14 = vsel %vm752_vm3, %v4235_v13, 0.0 }
 0x38a   : > { %980 = vadd.xlane.f32.xlu0 %v979_v14  ;;  %v1304_v14 = vld [vmem:[%s4533_s25 + $0x8] sm:$0xff] }
 0x397   : > { %1091 = vrot.lane.b32.xlu1 %v4595_v20, %s4350_s16 }
 0x39b   : > { %1139 = vrot.lane.b32.xlu1 %v4589_v16, %s4350_s16 }
 0x3a0   : > { %1043 = vrot.lane.b32.xlu0 %v4591_v17, %s4350_s16 }
 0x3a6   : > { %v972_v15 = vpop.xlane.xlu1 %971 }
 0x3a7   : > { %4236 = vrcp.f32 %v972_v15 }
 0x3b1   : > { %v4237_v18 = vpop.eup %4236 }
 0x3b2   : > { %v986_v19 = vmul.f32 %v4237_v18, %v4229_v58  ;;  %v1306_v18 = vld [vmem:[%s4533_s25 + $0x48] sm:$0xff] }
 0x3b4   : > { %v990_v21 = vpack.c.bf16 %v986_v19, %v986_v19  ;;  %v3575_v19 = vcombine.low %v1304_v14, %v1306_v18 }
 0x3b6   : > { %3985 = vmatmul.mubr.msk.bf16.vlgmr.msra.gmra.mrb[8].mxu1 %vm752_vm3, %v990_v21  ;;  %v3576_v21 = vcombine.high %v1304_v14, %v1306_v18  ;;  %v4123_v14 = vld [vmem:[%s4539_s20 + $0x1a8] sm:$0xff]   ;;  %v4125_v18 = vld [vmem:[%s4539_s20 + $0x1f0] sm:$0xff]  }
 0x3b7   : > { %3996 = vmatprep.mubr.msk.bf16.mxu1 %vm4345_vm1, %v4344_v2 }
 0x40f   : > { %v975_v22 = vpop.xlane.xlu0 %974 }
 0x410   : > { %4238 = vrcp.f32 %v975_v22  ;;  %v1307_v22 = vld [vmem:[%s4533_s25 + $0x80] sm:$0xff] }
 0x413   : > { %v978_v23 = vpop.xlane.xlu1 %977 }
 0x414   : > { %4240 = vrcp.f32 %v978_v23  ;;  %v1309_v23 = vld [vmem:[%s4533_s25 + $0xc0] sm:$0xff] }
 0x417   : > { %v1092_v20 = vpop.permute.xlu1 %1091  ;;  %v981_v24 = vpop.xlane.xlu0 %980 }
 0x418   : > { %v1097_v16 = vsel %vm999_vm4, %v1092_v20, 0  ;;  %4242 = vrcp.f32 %v981_v24  ;;  %v1308_v20 = vld [vmem:[%s4533_s25 + $0x88] sm:$0xff]  ;;  %v3578_v24 = vcombine.high %v1307_v22, %v1309_v23 }
 0x419   : > { %3995 = vmatpush3.bf16.msra.mxu1 %v1097_v16  ;;  %v1310_v16 = vld [vmem:[%s4533_s25 + $0xc8] sm:$0xff] }
 0x41a   : > { %v4239_v17 = vpop.eup %4238  ;;  %4006 = vmatprep.subr.bf16.mxu1 %v4344_v2 }
 0x41b   : > { %v987_v25 = vmul.f32 %v4239_v17, %v4231_v9  ;;  %v1044_v26 = vpop.permute.xlu0 %1043  ;;  %v1140_v28 = vpop.permute.xlu1 %1139  ;;  %v3577_v17 = vcombine.low %v1307_v22, %v1309_v23  ;;  %v4129_v22 = vld [vmem:[%s4539_s20 + $0x1f8] sm:$0xff]  }
 0x41c   : > { %v1049_v27 = vsel %vm999_vm4, %v1044_v26, 0  ;;  %v1145_v32 = vsel %vm999_vm4, %v1140_v28, 0  ;;  %v3580_v26 = vcombine.high %v1308_v20, %v1310_v16  ;;  %v1532_v28 = vld [vmem:[%s4533_s25 + $0x50] sm:$0xff]  ;;  %v4130_v23 = vld [vmem:[%s4539_s20 + $0x138] sm:$0xff]  }
 0x41d   : > { %3989 = vmatpush3.bf16.msra.mxu0 %v1049_v27  ;;  %v991_v29 = vpack.c.bf16 %v987_v25, %v987_v25  ;;  %v3579_v25 = vcombine.low %v1308_v20, %v1310_v16  ;;  %v1530_v27 = vld [vmem:[%s4533_s25 + $0x10] sm:$0xff]  ;;  %v4131_v20 = vld [vmem:[%s4539_s20 + $0x1b8] sm:$0xff]   ;;  %v4133_v16 = vld [vmem:[%s4539_s20 + $0xc0] sm:$0xff]  }
 0x41e   : > { %v4241_v30 = vpop.eup %4240  ;;  %4000 = vmatprep.subr.bf16.mxu0 %v4344_v2 }
 0x41f   : > { %v988_v31 = vmul.f32 %v4241_v30, %v4233_v11  ;;  %v3584_v30 = vcombine.high %v1530_v27, %v1532_v28 }
 0x420   : > { %3991 = vmatmul.mubr.msk.bf16.vlgmr.msra.gmra.mrb[12].mxu0 %vm752_vm3, %v991_v29  ;;  %v1531_v29 = vld [vmem:[%s4533_s25 + $0x18] sm:$0xff] }
 0x421   : > { %4001 = vmatpush3.bf16.msra.mxu0 %v1145_v32  ;;  %v992_v33 = vpack.c.bf16 %v988_v31, %v988_v31  ;;  %4002 = vmatprep.mubr.msk.bf16.mxu0 %vm4345_vm1, %v4344_v2  ;;  %v1533_v31 = vld [vmem:[%s4533_s25 + $0x58] sm:$0xff]  ;;  %v4354_v32 = vmov 0  }
 0x422   : > { %v4243_v34 = vpop.eup %4242 }
 0x423   : > { %v989_v35 = vmul.f32 %v4243_v34, %v4235_v13  ;;  %3997 = vmatmul.mubr.msk.bf16.vlgmr.msra.gmra.mrb[12].mxu1 %vm752_vm3, %v992_v33  ;;  %v1305_v13 = vld [vmem:[%s4533_s25 + $0x40] sm:$0xff]  ;;  %v3583_v33 = vcombine.low %v1530_v27, %v1532_v28  ;;  %v3585_v34 = vcombine.low %v1531_v29, %v1533_v31 }
 0x424   : > { %4010 = vmatprep.mubr.msk.bf16.mxu1 %vm4345_vm1, %v4344_v2  ;;  %4007 = vmatpush3.bf16.msra.mxu1 %v4098_v41  ;;  %v3574_v15 = vcombine.high %v1303_v12, %v1305_v13 }
 0x425   : > { %v993_v36 = vpack.c.bf16 %v989_v35, %v989_v35  ;;  %4008 = vmatprep.subr.bf16.mxu1 %v4344_v2  ;;  %v3586_v35 = vcombine.high %v1531_v29, %v1533_v31 }
 0x426   : > { %1440 = vmatprep.subr.bf16.mxu0 %v3574_v15  ;;  %v4124_v15 = vld [vmem:[%s4539_s20 + $0x170] sm:$0xff]  }
 0x428   : > { %4003 = vmatmul.mubr.msk.bf16.vlgmr.msra.gmra.mrb[16].mxu0 %vm752_vm3, %v993_v36  ;;  %4009 = vmatpush3.bf16.msra.mxu1 %v4099_v42  ;;  %v3572_v42 = vld [vmem:[%s636_s27] ss:$0 sm:$0xff] }
 0x429   : > { %1481 = vmatprep.subr.bf16.mxu1 %v3576_v21  ;;  %1472 = vmatprep.mubr.bf16.mxu0 %v4354_v32  ;;  %v4128_v21 = vld [vmem:[%s4539_s20 + $0x178] sm:$0xff]  }
 0x489   : > { %v1037_v37 = vpop.f32.mrb[8].mxu1 }
 0x48a   : > { %v3986_v38 = vpop.f32.mrb[9].mxu1 }
 0x48b   : > { %v1040_v39 = vpop.f32.mrb[10].mxu1 }
 0x48c   : > { %v3987_v40 = vpop.f32.mrb[11].mxu1 }
 0x48d   : > { %v3571_v40 = vld [vmem:[%s633_s0] ss:$0 sm:$0xff] }
 0x4f3   : > { %v1085_v43 = vpop.f32.mrb[12].mxu0 }
 0x4f4   : > { %1188 = vrot.lane.b32.xlu0 %v1085_v43, %s4351_s22  ;;  %v3992_v44 = vpop.f32.mrb[13].mxu0  ;;  %s3345_s22 = sshll.u32 %s4561_s7, 4  ;;  %s4948_s22 = int_to_ptr.vmem [resolvable:$true] %s3345_s22 }
 0x4f5   : > { %v1088_v45 = vpop.f32.mrb[14].mxu0  ;;  %v1534_v44 = vld [vmem:[%s4533_s25 + $0x90] sm:$0xff]  ;;  %s4248_s30 = scalar_lea.vmem %s4948_s22, 128 }
 0x4f6   : > { %v3993_v46 = vpop.f32.mrb[15].mxu0  ;;  %v1133_v47 = vpop.f32.mrb[12].mxu1  ;;  %v1536_v45 = vld [vmem:[%s4533_s25 + $0xd0] sm:$0xff]  ;;  %p4249_p1 = scmp.ne.s32.totalorder %s4948_s22, %s4248_s30 }
 0x4f7   : > { %1192 = vrot.lane.b32.xlu1 %v1133_v47, %s4352_s23  ;;  %v3998_v48 = vpop.f32.mrb[13].mxu1  ;;  %v1535_v46 = vld [vmem:[%s4533_s25 + $0x98] sm:$0xff] }
 0x4f8   : > { %v1136_v49 = vpop.f32.mrb[14].mxu1  ;;  %v1537_v47 = vld [vmem:[%s4533_s25 + $0xd8] sm:$0xff]  ;;  %p4250_p2 = pnand %p4249_p1, %p4475_p3 }
 0x4f9   : > { %v3999_v50 = vpop.f32.mrb[15].mxu1 }
 0x4fa   : > { %v3588_v50 = vcombine.high %v1534_v44, %v1536_v45  ;;  %p4251_p4 = pneg %p4250_p2 }
 0x4fb   : > { %v1181_v51 = vpop.f32.mrb[16].mxu0 }
 0x4fc   : > { %1196 = vrot.lane.b32.xlu0 %v1181_v51, %s4353_s24  ;;  %v4004_v52 = vpop.f32.mrb[17].mxu0  ;;  %v3590_v51 = vcombine.high %v1535_v46, %v1537_v47 }
 0x4fd   : > { %v1184_v2 = vpop.f32.mrb[18].mxu0  ;;  %v3587_v52 = vcombine.low %v1534_v44, %v1536_v45 }
 0x4fe   : > { %v4005_v53 = vpop.f32.mrb[19].mxu0  ;;  %v3589_v2 = vcombine.low %v1535_v46, %v1537_v47 }
 0x4ff   : > { %v4100_v53 = vld [vmem:[%s4539_s20 + $0x140] sm:$0xff]  }
 0x566   : > { %v1189_v54 = vpop.permute.xlu0 %1188 }
 0x567   : > { %v1199_v56 = vsel %vm752_vm3, %v1037_v37, %v1189_v54  ;;  %v4101_v54 = vld [vmem:[%s4539_s20 + $0x1c0] sm:$0xff]  }
 0x569   : > { %v1193_v55 = vpop.permute.xlu1 %1192 }
 0x56a   : > { %v1201_v57 = vsel %vm1200_vm5, %v1199_v56, %v1193_v55  ;;  %v4102_v55 = vld [vmem:[%s4539_s20 + $0x100] sm:$0xff]  }
 0x56b   : > { %v4103_v56 = vld [vmem:[%s4539_s20 + $0x180] sm:$0xff]  }
 0x56e   : > { %v1197_v58 = vpop.permute.xlu0 %1196 }
 0x56f   : > { %v1203_v59 = vsel %vm1202_vm6, %v1201_v57, %v1197_v58  ;;  %v4104_v57 = vld [vmem:[%s4539_s20 + $0x148] sm:$0xff]  }
 0x570   : > { %v1204_v60 = vpack.c.bf16 %v1203_v59, %v1203_v59  ;;  %v4105_v58 = vld [vmem:[%s4539_s20 + $0x1c8] sm:$0xff]  }
 0x571   : > { %v4106_v59 = vld [vmem:[%s4539_s20 + $0x108] sm:$0xff]  }
 0x572   : > { %4011 = vmatmul.mubr.msk.bf16.vlgmr.msra.gmra.mrb[16].mxu1 %vm676_vm2, %v1204_v60  ;;  %v4107_v60 = vld [vmem:[%s4539_s20 + $0x188] sm:$0xff]  }
 0x573   : > { %1482 = vmatpush1.bf16.msra.mxu1 %v3575_v19  ;;  %1513 = vmatprep.mubr.bf16.mxu1 %v4354_v32  ;;  %v4127_v19 = vld [vmem:[%s4539_s20 + $0x1b0] sm:$0xff]  }
 0x574   : > { %1483 = vmatprep.subr.bf16.mxu1 %v3580_v26 }
 0x577   : > { %1484 = vmatpush1.bf16.msra.mxu1 %v3579_v25 }
 0x578   : > { %1705 = vmatprep.subr.bf16.mxu1 %v3586_v35 }
 0x645   : > { %v1265_v62 = vpop.f32.mrb[16].mxu1 }
 0x646   : > { %v1266_v63 = vadd.f32 %v3567_v61, %v1265_v62  ;;  %v4012_v0 = vpop.f32.mrb[17].mxu1  ;;  %v4108_v61 = vld [vmem:[%s4539_s20 + $0x150] sm:$0xff]  }
 0x647   : > { %v1268_v1 = vpop.f32.mrb[18].mxu1  ;;  %v4109_v62 = vld [vmem:[%s4539_s20 + $0x1d0] sm:$0xff]  }
 0x648   : > { %v4013_v3 = vpop.f32.mrb[19].mxu1  ;;  %v1271_v5 = vadd.f32 %v1266_v63, %v4570_v4  ;;  %v3573_v4 = vcombine.low %v1303_v12, %v1305_v13  ;;  %v4110_v63 = vld [vmem:[%s4539_s20 + $0x110] sm:$0xff]   ;;  %v4112_v1 = vld [vmem:[%s4539_s20 + $0x158] sm:$0xff]   ;;  %v4121_v12 = vld [vmem:[%s4539_s20 + $0x1e8] sm:$0xff]  }
 0x649   : > { %v4111_v0 = vld [vmem:[%s4539_s20 + $0x190] sm:$0xff]   ;;  %v4113_v3 = vld [vmem:[%s4539_s20 + $0x1d8] sm:$0xff]   ;;  %v4122_v13 = vld [vmem:[%s4539_s20 + $0x128] sm:$0xff]  }
 0x64a   : > { %v1274_v6 = vsel %vm676_vm2, %v1271_v5, 0.0  ;;  %1441 = vmatpush1.bf16.msra.mxu0 %v3573_v4  ;;  %v4126_v4 = vld [vmem:[%s4539_s20 + $0x130] sm:$0xff]  }
 0x64b   : > { %1275 = vadd.xlane.f32.xlu1 %v1274_v6  ;;  %1442 = vmatprep.subr.bf16.mxu0 %v3578_v24  ;;  %v4115_v6 = vld [vmem:[%s4539_s20 + $0x198] sm:$0xff]   ;;  %v4132_v24 = vld [vmem:[%s4539_s20 + $0x40] sm:$0xff]  }
 0x64e   : > { %1443 = vmatpush1.bf16.msra.mxu0 %v3577_v17  ;;  %v1377_v17 = vlaneseq }
 0x64f   : > { %1664 = vmatprep.subr.bf16.mxu0 %v3584_v30 }
 0x650   : > { %v1378_v25 = vshrl.u32 %v1377_v17, 7  ;;  %v4147_v17 = vld [vmem:[%s4539_s20 + $0x98] sm:$0xff]  }
 0x652   : > { %v4746_v28 = vsub.s32 1, %v1378_v25  ;;  %v4748_v30 = vsub.s32 3, %v1378_v25 }
 0x6d8   : > { %v1276_v7 = vpop.xlane.xlu1 %1275 }
 0x6d9   : > { %v1278_v8 = vmul.f32 0.03125, %v1276_v7  ;;  %v4116_v7 = vld [vmem:[%s4539_s20 + $0x160] sm:$0xff]  }
 0x6db   : > { %v1279_v9 = vsub.f32 %v1271_v5, %v1278_v8  ;;  %v4114_v5 = vld [vmem:[%s4539_s20 + $0x118] sm:$0xff]   ;;  %v4117_v8 = vld [vmem:[%s4539_s20 + $0x1e0] sm:$0xff]  }
 0x6dd   : > { %v1280_v10 = vmul.f32 %v1279_v9, %v1279_v9 }
 0x6df   : > { %v1281_v11 = vsel %vm676_vm2, %v1280_v10, 0.0  ;;  %v4119_v10 = vld [vmem:[%s4539_s20 + $0x1a0] sm:$0xff]  }
 0x6e0   : > { %1282 = vadd.xlane.f32.xlu0 %v1281_v11  ;;  %v4120_v11 = vld [vmem:[%s4539_s20 + $0x168] sm:$0xff]  }
 0x76d   : > { %v1283_v36 = vpop.xlane.xlu0 %1282 }
 0x76e   : > { %v1284_v37 = vmul.f32 0.03125, %v1283_v36  ;;  %v1538_v36 = vld [vmem:[%s4528_s12 + $0x4] sm:$0xf] }
 0x76f   : > { %v1611_v45 = vrot.slane %v1538_v36, %v4746_v28  ;;  %v1619_v46 = vrot.slane %v1538_v36, %v4748_v30 }
 0x770   : > { %v1285_v38 = vadd.f32 1e-05, %v1284_v37  ;;  %v4754_v37 = vsub.s32 0, %v1378_v25 }
 0x772   : > { %4244 = vrsqrt.f32 %v1285_v38  ;;  %v4756_v38 = vsub.s32 2, %v1378_v25  ;;  %v4148_v25 = vld [vmem:[%s4539_s20 + $0x60] sm:$0xff]  }
 0x774   : > { %v1615_v44 = vrot.slane %v1538_v36, %v4756_v38 }
 0x77c   : > { %v4245_v39 = vpop.eup %4244 }
 0x77d   : > { %v1287_v41 = vmul.f32 %v4245_v39, %v1279_v9  ;;  %v4118_v9 = vld [vmem:[%s4539_s20 + $0x120] sm:$0xff]  }
 0x77f   : > { %v1294_v43 = vmul.f32 %v3571_v40, %v1287_v41 }
 0x781   : > { %v4692_v48 = vadd.f32 %v3572_v42, %v1294_v43  ;;  %v1607_v43 = vrot.slane %v1538_v36, %v4754_v37  ;;  %v4153_v36 = vld [vmem:[%s4539_s20 + $0xe8] sm:$0xff]  }
 0x783   : > { %v4696_v49 = vpack.c.bf16 %v4692_v48, %v4692_v48 }
 0x785   : > { %3581 = vmatmul.mubr.msk.bf16.vlgmr.msra.gmra.mrb[20].mxu0 %vm676_vm2, %v4696_v49  ;;  %3582 = vmatmul.mubr.msk.bf16.vlgmr.msra.gmra.mrb[20].mxu1 %vm676_vm2, %v4696_v49 }
 0x786   : > { %1665 = vmatpush1.bf16.msra.mxu0 %v3583_v33  ;;  %1706 = vmatpush1.bf16.msra.mxu1 %v3585_v34  ;;  %v4751_v33 = vld [vmem:[%s4528_s12] sm:$0xf] }
 0x787   : > { %1666 = vmatprep.subr.bf16.mxu0 %v3588_v50  ;;  %1707 = vmatprep.subr.bf16.mxu1 %v3590_v51  ;;  %v1384_v41 = vrot.slane %v4751_v33, %v4746_v28  ;;  %v1392_v42 = vrot.slane %v4751_v33, %v4748_v30 }
 0x788   : > { %1696 = vmatprep.mubr.bf16.mxu0 %v4354_v32  ;;  %1737 = vmatprep.mubr.bf16.mxu1 %v4354_v32 }
 0x78a   : > { %1667 = vmatpush1.bf16.msra.mxu0 %v3587_v52  ;;  %1708 = vmatpush1.bf16.msra.mxu1 %v3589_v2 }
 0x78b   : > { %3774 = vmatprep.subr.bf16.mxu0 %v4100_v53  ;;  %3796 = vmatprep.subr.bf16.mxu1 %v4101_v54 }
 0x78d   : > { %3591 = vmatmul.mubr.msk.bf16.vlgmr.msra.gmra.mrb[24].mxu0 %vm676_vm2, %v4696_v49  ;;  %3592 = vmatmul.mubr.msk.bf16.vlgmr.msra.gmra.mrb[24].mxu1 %vm676_vm2, %v4696_v49 }
 0x78e   : > { %3775 = vmatpush3.bf16.msra.mxu0 %v4102_v55  ;;  %3797 = vmatpush3.bf16.msra.mxu1 %v4103_v56 }
 0x78f   : > { %3776 = vmatprep.subr.bf16.mxu0 %v4104_v57  ;;  %3798 = vmatprep.subr.bf16.mxu1 %v4105_v58 }
 0x792   : > { %3777 = vmatpush3.bf16.msra.mxu0 %v4106_v59  ;;  %3799 = vmatpush3.bf16.msra.mxu1 %v4107_v60 }
 0x793   : > { %3778 = vmatprep.subr.bf16.mxu0 %v4108_v61  ;;  %3800 = vmatprep.subr.bf16.mxu1 %v4109_v62 }
 0x796   : > { %3779 = vmatpush3.bf16.msra.mxu0 %v4110_v63  ;;  %3801 = vmatpush3.bf16.msra.mxu1 %v4111_v0 }
 0x797   : > { %3780 = vmatprep.subr.bf16.mxu0 %v4112_v1  ;;  %3802 = vmatprep.subr.bf16.mxu1 %v4113_v3 }
 0x79a   : > { %3781 = vmatpush3.bf16.msra.mxu0 %v4114_v5  ;;  %3803 = vmatpush3.bf16.msra.mxu1 %v4115_v6 }
 0x79b   : > { %3782 = vmatprep.subr.bf16.mxu0 %v4116_v7  ;;  %3804 = vmatprep.subr.bf16.mxu1 %v4117_v8  ;;  %v4134_v8 = vld [vmem:[%s4539_s20] sm:$0xff]  }
 0x79e   : > { %3783 = vmatpush3.bf16.msra.mxu0 %v4118_v9  ;;  %3805 = vmatpush3.bf16.msra.mxu1 %v4119_v10  ;;  %v4135_v9 = vld [vmem:[%s4539_s20 + $0x80] sm:$0xff]  }
 0x79f   : > { %3784 = vmatprep.subr.bf16.mxu0 %v4120_v11  ;;  %3806 = vmatprep.subr.bf16.mxu1 %v4121_v12  ;;  %v4136_v12 = vld [vmem:[%s4539_s20 + $0x48] sm:$0xff]  }
 0x7a2   : > { %3785 = vmatpush3.bf16.msra.mxu0 %v4122_v13  ;;  %3807 = vmatpush3.bf16.msra.mxu1 %v4123_v14  ;;  %v4137_v13 = vld [vmem:[%s4539_s20 + $0xc8] sm:$0xff]  }
 0x7a3   : > { %3786 = vmatprep.subr.bf16.mxu0 %v4124_v15  ;;  %3808 = vmatprep.subr.bf16.mxu1 %v4125_v18  ;;  %v4138_v18 = vld [vmem:[%s4539_s20 + $0x8] sm:$0xff]  }
 0x7a6   : > { %3787 = vmatpush3.bf16.msra.mxu0 %v4126_v4  ;;  %3809 = vmatpush3.bf16.msra.mxu1 %v4127_v19  ;;  %v4139_v4 = vld [vmem:[%s4539_s20 + $0x88] sm:$0xff]   ;;  %v4140_v19 = vld [vmem:[%s4539_s20 + $0x50] sm:$0xff]  }
 0x7a7   : > { %3788 = vmatprep.subr.bf16.mxu0 %v4128_v21  ;;  %3810 = vmatprep.subr.bf16.mxu1 %v4129_v22  ;;  %v4141_v21 = vld [vmem:[%s4539_s20 + $0xd0] sm:$0xff]  }
 0x7a8   : > { %v4142_v22 = vld [vmem:[%s4539_s20 + $0x10] sm:$0xff]  }
 0x7aa   : > { %3789 = vmatpush3.bf16.msra.mxu0 %v4130_v23  ;;  %3811 = vmatpush3.bf16.msra.mxu1 %v4131_v20  ;;  %v4143_v23 = vld [vmem:[%s4539_s20 + $0x90] sm:$0xff]   ;;  %v4144_v20 = vld [vmem:[%s4539_s20 + $0x58] sm:$0xff]  }
 0x7ab   : > { %3818 = vmatprep.subr.bf16.mxu0 %v4132_v24  ;;  %3840 = vmatprep.subr.bf16.mxu1 %v4133_v16  ;;  %v4145_v24 = vld [vmem:[%s4539_s20 + $0xd8] sm:$0xff]  }
 0x7ac   : > { %v4146_v16 = vld [vmem:[%s4539_s20 + $0x18] sm:$0xff]  }
 0x858   : > { %v4742_v26 = vpop.f32.mrb[20].mxu0  ;;  %v4744_v27 = vpop.f32.mrb[20].mxu1 }
 0x859   : > { %v1476_v29 = vpop.f32.mrb[21].mxu0  ;;  %v1517_v31 = vpop.f32.mrb[21].mxu1 }
 0x85a   : > { %v1478_v34 = vpop.f32.mrb[22].mxu0  ;;  %v1519_v35 = vpop.f32.mrb[22].mxu1  ;;  %v1477_v51 = vadd.f32 %v1476_v29, %v1384_v41  ;;  %v1518_v52 = vadd.f32 %v1517_v31, %v1392_v42  ;;  %v4149_v29 = vld [vmem:[%s4539_s20 + $0xe0] sm:$0xff]   ;;  %v1380_v41 = vrot.slane %v4751_v33, %v4754_v37  ;;  %v1388_v42 = vrot.slane %v4751_v33, %v4756_v38  ;;  %v4160_v33 = vld [vmem:[%s4539_s20 + $0x78] sm:$0xff]  }
 0x85b   : > { %v1479_v39 = vpop.f32.mrb[23].mxu0  ;;  %v1520_v40 = vpop.f32.mrb[23].mxu1  ;;  %v4150_v31 = vld [vmem:[%s4539_s20 + $0x20] sm:$0xff]   ;;  %v4152_v35 = vld [vmem:[%s4539_s20 + $0x68] sm:$0xff]  }
 0x85c   : > { %v1523_v3 = vmax.f32 %v1477_v51, 0.0  ;;  %v1525_v5 = vmax.f32 %v1518_v52, 0.0  ;;  %v4151_v34 = vld [vmem:[%s4539_s20 + $0xa0] sm:$0xff]   ;;  %v4154_v39 = vld [vmem:[%s4539_s20 + $0x28] sm:$0xff]   ;;  %v4161_v51 = vld [vmem:[%s4539_s20 + $0xf8] sm:$0xff]  }
 0x85d   : > { %v4155_v40 = vld [vmem:[%s4539_s20 + $0xa8] sm:$0xff]   ;;  %v2298_v52 = vld [vmem:[%s4533_s25 + $0x20] sm:$0xff] }
 0x85e   : > { %v1527_v14 = vpack.c.bf16 %v1523_v3, %v1523_v3  ;;  %v1529_v15 = vpack.c.bf16 %v1525_v5, %v1525_v5 }
 0x860   : > { %v1698_v47 = vpop.f32.mrb[24].mxu0  ;;  %v1739_v50 = vpop.f32.mrb[24].mxu1 }
 0x861   : > { %v1699_v2 = vadd.f32 %v1698_v47, %v1607_v43  ;;  %v1740_v53 = vadd.f32 %v1739_v50, %v1615_v44  ;;  %v1700_v54 = vpop.f32.mrb[25].mxu0  ;;  %v1741_v55 = vpop.f32.mrb[25].mxu1  ;;  %v4156_v43 = vld [vmem:[%s4539_s20 + $0x70] sm:$0xff]   ;;  %v1475_v47 = vadd.f32 %v4742_v26, %v1380_v41  ;;  %v1516_v50 = vadd.f32 %v4744_v27, %v1388_v42 }
 0x862   : > { %v1701_v56 = vadd.f32 %v1700_v54, %v1611_v45  ;;  %v1742_v57 = vadd.f32 %v1741_v55, %v1619_v46  ;;  %v1702_v58 = vpop.f32.mrb[26].mxu0  ;;  %v1743_v59 = vpop.f32.mrb[26].mxu1  ;;  %v4157_v44 = vld [vmem:[%s4539_s20 + $0xf0] sm:$0xff]   ;;  %v2301_v54 = vld [vmem:[%s4533_s25 + $0x68] sm:$0xff]  ;;  %v4162_v55 = vld [vmem:[%s4539_s20 + $0x38] sm:$0xff]  }
 0x863   : > { %v1746_v60 = vmax.f32 %v1699_v2, 0.0  ;;  %v1748_v61 = vmax.f32 %v1740_v53, 0.0  ;;  %v1703_v62 = vpop.f32.mrb[27].mxu0  ;;  %v1744_v63 = vpop.f32.mrb[27].mxu1  ;;  %v4158_v45 = vld [vmem:[%s4539_s20 + $0x30] sm:$0xff]   ;;  %v2300_v2 = vld [vmem:[%s4533_s25 + $0x60] sm:$0xff] }
 0x864   : > { %v1747_v0 = vmax.f32 %v1701_v56, 0.0  ;;  %v1749_v1 = vmax.f32 %v1742_v57, 0.0  ;;  %v4159_v46 = vld [vmem:[%s4539_s20 + $0xb0] sm:$0xff]   ;;  %v2299_v53 = vld [vmem:[%s4533_s25 + $0x28] sm:$0xff]  ;;  %v4163_v56 = vld [vmem:[%s4539_s20 + $0xb8] sm:$0xff]   ;;  %v1522_v57 = vmax.f32 %v1475_v47, 0.0  ;;  %v3658_v27 = vcombine.high %v2298_v52, %v2300_v2 }
 0x865   : > { %v1750_v10 = vpack.c.bf16 %v1746_v60, %v1746_v60  ;;  %v1752_v11 = vpack.c.bf16 %v1748_v61, %v1748_v61  ;;  %v1524_v26 = vmax.f32 %v1516_v50, 0.0  ;;  %v3660_v58 = vcombine.high %v2299_v53, %v2301_v54  ;;  %v2302_v59 = vld [vmem:[%s4533_s25 + $0xa0] sm:$0xff]  ;;  %v2303_v61 = vld [vmem:[%s4533_s25 + $0xa8] sm:$0xff]  ;;  %v4189_v41 = vld [vmem:[%s4539_s20 + $0x2f0] sm:$0xff]  }
 0x866   : > { %v1751_v6 = vpack.c.bf16 %v1747_v0, %v1747_v0  ;;  %v1753_v7 = vpack.c.bf16 %v1749_v1, %v1749_v1  ;;  %v2304_v60 = vld [vmem:[%s4533_s25 + $0xe0] sm:$0xff]  ;;  %v2305_v62 = vld [vmem:[%s4533_s25 + $0xe8] sm:$0xff]  ;;  %v3657_v63 = vcombine.low %v2298_v52, %v2300_v2  ;;  %v3659_v0 = vcombine.low %v2299_v53, %v2301_v54  ;;  %v4190_v42 = vld [vmem:[%s4539_s20 + $0x230] sm:$0xff]  }
 0x867   : > { %v3662_v1 = vcombine.high %v2302_v59, %v2304_v60  ;;  %v1526_v3 = vpack.c.bf16 %v1522_v57, %v1522_v57  ;;  %v1528_v5 = vpack.c.bf16 %v1524_v26, %v1524_v26  ;;  %v4195_v47 = vld [vmem:[%s4539_s20 + $0x2b8] sm:$0xff]   ;;  %v4849_v50 = vld [vmem:[%s4533_s25 + $0x30] sm:$0xff] }
 0x868   : > { %1978 = vmatprep.mubr.bf16.mxu0 %v1751_v6  ;;  %2018 = vmatprep.mubr.bf16.mxu1 %v1753_v7  ;;  %v3664_v6 = vcombine.high %v2303_v61, %v2305_v62  ;;  %v3661_v7 = vcombine.low %v2302_v59, %v2304_v60  ;;  %v4860_v2 = vld [vmem:[%s4533_s25 + $0x78] sm:$0xff] }
 0x869   : > { %1979 = vmatmul.mubr.bf16.vlgmr.msra.gmra.mrb[28].mxu0 %v1750_v10  ;;  %2019 = vmatmul.mubr.bf16.vlgmr.msra.gmra.mrb[28].mxu1 %v1752_v11  ;;  %v4165_v10 = vld [vmem:[%s4539_s20 + $0x2c0] sm:$0xff]  }
 0x86a   : > { %3819 = vmatpush3.bf16.msra.mxu0 %v4134_v8  ;;  %3841 = vmatpush3.bf16.msra.mxu1 %v4135_v9  ;;  %v3663_v8 = vcombine.low %v2303_v61, %v2305_v62  ;;  %v4164_v9 = vld [vmem:[%s4539_s20 + $0x240] sm:$0xff]  }
 0x86b   : > { %2250 = vmatprep.mubr.bf16.mxu0 %v1527_v14  ;;  %2290 = vmatprep.mubr.bf16.mxu1 %v1529_v15  ;;  %v4166_v11 = vld [vmem:[%s4539_s20 + $0x200] sm:$0xff]   ;;  %v4169_v14 = vld [vmem:[%s4539_s20 + $0x2c8] sm:$0xff]  }
 0x86c   : > { %3820 = vmatprep.subr.bf16.mxu0 %v4136_v12  ;;  %3842 = vmatprep.subr.bf16.mxu1 %v4137_v13  ;;  %v4167_v12 = vld [vmem:[%s4539_s20 + $0x280] sm:$0xff]   ;;  %v4168_v13 = vld [vmem:[%s4539_s20 + $0x248] sm:$0xff]  }
 0x86d   : > { %v4170_v15 = vld [vmem:[%s4539_s20 + $0x208] sm:$0xff]  }
 0x86e   : > { %3821 = vmatpush3.bf16.msra.mxu0 %v4138_v18  ;;  %3843 = vmatpush3.bf16.msra.mxu1 %v4139_v4  ;;  %v4171_v18 = vld [vmem:[%s4539_s20 + $0x288] sm:$0xff]   ;;  %v4172_v4 = vld [vmem:[%s4539_s20 + $0x250] sm:$0xff]  }
 0x86f   : > { %3822 = vmatprep.subr.bf16.mxu0 %v4140_v19  ;;  %3844 = vmatprep.subr.bf16.mxu1 %v4141_v21  ;;  %v4173_v19 = vld [vmem:[%s4539_s20 + $0x2d0] sm:$0xff]  }
 0x870   : > { %v4174_v21 = vld [vmem:[%s4539_s20 + $0x210] sm:$0xff]  }
 0x872   : > { %3823 = vmatpush3.bf16.msra.mxu0 %v4142_v22  ;;  %3845 = vmatpush3.bf16.msra.mxu1 %v4143_v23  ;;  %v4175_v22 = vld [vmem:[%s4539_s20 + $0x290] sm:$0xff]   ;;  %v4176_v23 = vld [vmem:[%s4539_s20 + $0x258] sm:$0xff]  }
 0x873   : > { %3824 = vmatprep.subr.bf16.mxu0 %v4144_v20  ;;  %3846 = vmatprep.subr.bf16.mxu1 %v4145_v24  ;;  %v4177_v20 = vld [vmem:[%s4539_s20 + $0x2d8] sm:$0xff]  }
 0x874   : > { %v4178_v24 = vld [vmem:[%s4539_s20 + $0x218] sm:$0xff]  }
 0x876   : > { %3825 = vmatpush3.bf16.msra.mxu0 %v4146_v16  ;;  %3847 = vmatpush3.bf16.msra.mxu1 %v4147_v17  ;;  %v4179_v16 = vld [vmem:[%s4539_s20 + $0x298] sm:$0xff]   ;;  %v4180_v17 = vld [vmem:[%s4539_s20 + $0x260] sm:$0xff]  }
 0x877   : > { %3826 = vmatprep.subr.bf16.mxu0 %v4148_v25  ;;  %3848 = vmatprep.subr.bf16.mxu1 %v4149_v29  ;;  %v4181_v25 = vld [vmem:[%s4539_s20 + $0x2e0] sm:$0xff]  }
 0x878   : > { %v4182_v29 = vld [vmem:[%s4539_s20 + $0x220] sm:$0xff]  }
 0x87a   : > { %3827 = vmatpush3.bf16.msra.mxu0 %v4150_v31  ;;  %3849 = vmatpush3.bf16.msra.mxu1 %v4151_v34  ;;  %v4183_v31 = vld [vmem:[%s4539_s20 + $0x2a0] sm:$0xff]   ;;  %v4184_v34 = vld [vmem:[%s4539_s20 + $0x268] sm:$0xff]  }
 0x87b   : > { %3828 = vmatprep.subr.bf16.mxu0 %v4152_v35  ;;  %3850 = vmatprep.subr.bf16.mxu1 %v4153_v36  ;;  %v4185_v35 = vld [vmem:[%s4539_s20 + $0x2e8] sm:$0xff]  }
 0x87c   : > { %v4186_v36 = vld [vmem:[%s4539_s20 + $0x228] sm:$0xff]  }
 0x87e   : > { %3829 = vmatpush3.bf16.msra.mxu0 %v4154_v39  ;;  %3851 = vmatpush3.bf16.msra.mxu1 %v4155_v40  ;;  %v4187_v39 = vld [vmem:[%s4539_s20 + $0x2a8] sm:$0xff]   ;;  %v4188_v40 = vld [vmem:[%s4539_s20 + $0x270] sm:$0xff]  }
 0x87f   : > { %3830 = vmatprep.subr.bf16.mxu0 %v4156_v43  ;;  %3852 = vmatprep.subr.bf16.mxu1 %v4157_v44  ;;  %v4191_v43 = vld [vmem:[%s4539_s20 + $0x2b0] sm:$0xff]   ;;  %v4192_v44 = vld [vmem:[%s4539_s20 + $0x278] sm:$0xff]  }
 0x882   : > { %3831 = vmatpush3.bf16.msra.mxu0 %v4158_v45  ;;  %3853 = vmatpush3.bf16.msra.mxu1 %v4159_v46  ;;  %v4193_v45 = vld [vmem:[%s4539_s20 + $0x2f8] sm:$0xff]  }
 0x883   : > { %3832 = vmatprep.subr.bf16.mxu0 %v4160_v33  ;;  %3854 = vmatprep.subr.bf16.mxu1 %v4161_v51  ;;  %v4194_v46 = vld [vmem:[%s4539_s20 + $0x238] sm:$0xff]   ;;  %v4852_v33 = vld [vmem:[%s4533_s25 + $0x70] sm:$0xff] }
 0x884   : > { %v4855_v51 = vld [vmem:[%s4533_s25 + $0x38] sm:$0xff]  ;;  %v3700_v52 = vcombine.high %v4849_v50, %v4852_v33  ;;  %v3699_v53 = vcombine.low %v4849_v50, %v4852_v33 }
 0x885   : > { %v3701_v54 = vcombine.low %v4855_v51, %v4860_v2 }
 0x886   : > { %3833 = vmatpush3.bf16.msra.mxu0 %v4162_v55  ;;  %3855 = vmatpush3.bf16.msra.mxu1 %v4163_v56  ;;  %v3702_v55 = vcombine.high %v4855_v51, %v4860_v2 }
 0x887   : > { %2432 = vmatprep.subr.bf16.mxu0 %v3658_v27  ;;  %2473 = vmatprep.subr.bf16.mxu1 %v3660_v58 }
 0x889   : > { %2251 = vmatmul.mubr.bf16.vlgmr.msra.gmra.mrb[32].mxu0 %v1526_v3  ;;  %2291 = vmatmul.mubr.bf16.vlgmr.msra.gmra.mrb[32].mxu1 %v1528_v5 }
 0x88a   : > { %2433 = vmatpush1.bf16.msra.mxu0 %v3657_v63  ;;  %2474 = vmatpush1.bf16.msra.mxu1 %v3659_v0 }
 0x88b   : > { %2434 = vmatprep.subr.bf16.mxu0 %v3662_v1  ;;  %2475 = vmatprep.subr.bf16.mxu1 %v3664_v6 }
 0x88c   : > { %2464 = vmatprep.mubr.bf16.mxu0 %v4354_v32  ;;  %2505 = vmatprep.mubr.bf16.mxu1 %v4354_v32 }
 0x88e   : > { %2435 = vmatpush1.bf16.msra.mxu0 %v3661_v7  ;;  %2476 = vmatpush1.bf16.msra.mxu1 %v3663_v8 }
 0x88f   : > { %3862 = vmatprep.subr.bf16.mxu0 %v4164_v9  ;;  %3884 = vmatprep.subr.bf16.mxu1 %v4165_v10 }
 0x891   : > { %3665 = vmatmul.mubr.msk.bf16.vlgmr.msra.gmra.mrb[36].mxu0 %vm676_vm2, %v4696_v49  ;;  %3666 = vmatmul.mubr.msk.bf16.vlgmr.msra.gmra.mrb[36].mxu1 %vm676_vm2, %v4696_v49 }
 0x892   : > { %3863 = vmatpush3.bf16.msra.mxu0 %v4166_v11  ;;  %3885 = vmatpush3.bf16.msra.mxu1 %v4167_v12  ;;  %v2306_v11 = vld [vmem:[%s4528_s12 + $0x8] sm:$0xf] }
 0x893   : > { %3864 = vmatprep.subr.bf16.mxu0 %v4168_v13  ;;  %3886 = vmatprep.subr.bf16.mxu1 %v4169_v14 }
 0x896   : > { %3865 = vmatpush3.bf16.msra.mxu0 %v4170_v15  ;;  %3887 = vmatpush3.bf16.msra.mxu1 %v4171_v18  ;;  %v2375_v15 = vrot.slane %v2306_v11, %v4754_v37  ;;  %v2383_v18 = vrot.slane %v2306_v11, %v4756_v38 }
 0x897   : > { %3866 = vmatprep.subr.bf16.mxu0 %v4172_v4  ;;  %3888 = vmatprep.subr.bf16.mxu1 %v4173_v19  ;;  %v2379_v19 = vrot.slane %v2306_v11, %v4746_v28 }
 0x89a   : > { %3867 = vmatpush3.bf16.msra.mxu0 %v4174_v21  ;;  %3889 = vmatpush3.bf16.msra.mxu1 %v4175_v22  ;;  %v2387_v21 = vrot.slane %v2306_v11, %v4748_v30  ;;  %v4218_v11 = vld [vmem:[%s4539_s20 + $0x328] sm:$0xff]  }
 0x89b   : > { %3868 = vmatprep.subr.bf16.mxu0 %v4176_v23  ;;  %3890 = vmatprep.subr.bf16.mxu1 %v4177_v20 }
 0x89e   : > { %3869 = vmatpush3.bf16.msra.mxu0 %v4178_v24  ;;  %3891 = vmatpush3.bf16.msra.mxu1 %v4179_v16 }
 0x89f   : > { %3870 = vmatprep.subr.bf16.mxu0 %v4180_v17  ;;  %3892 = vmatprep.subr.bf16.mxu1 %v4181_v25 }
 0x8a2   : > { %3871 = vmatpush3.bf16.msra.mxu0 %v4182_v29  ;;  %3893 = vmatpush3.bf16.msra.mxu1 %v4183_v31 }
 0x8a3   : > { %3872 = vmatprep.subr.bf16.mxu0 %v4184_v34  ;;  %3894 = vmatprep.subr.bf16.mxu1 %v4185_v35 }
 0x8a6   : > { %3873 = vmatpush3.bf16.msra.mxu0 %v4186_v36  ;;  %3895 = vmatpush3.bf16.msra.mxu1 %v4187_v39 }
 0x8a7   : > { %3874 = vmatprep.subr.bf16.mxu0 %v4188_v40  ;;  %3896 = vmatprep.subr.bf16.mxu1 %v4189_v41  ;;  %v2799_v41 = vld [vmem:[%s4533_s25 + $0xb0] sm:$0xff] }
 0x8aa   : > { %3875 = vmatpush3.bf16.msra.mxu0 %v4190_v42  ;;  %3897 = vmatpush3.bf16.msra.mxu1 %v4191_v43 }
 0x8ab   : > { %3876 = vmatprep.subr.bf16.mxu0 %v4192_v44  ;;  %3898 = vmatprep.subr.bf16.mxu1 %v4193_v45  ;;  %v2801_v44 = vld [vmem:[%s4533_s25 + $0xf0] sm:$0xff]  ;;  %v2800_v45 = vld [vmem:[%s4533_s25 + $0xb8] sm:$0xff] }
 0x8ae   : > { %3877 = vmatpush3.bf16.msra.mxu0 %v4194_v46  ;;  %3899 = vmatpush3.bf16.msra.mxu1 %v4195_v47  ;;  %v2802_v46 = vld [vmem:[%s4533_s25 + $0xf8] sm:$0xff] }
 0x8af   : > { %2929 = vmatprep.subr.bf16.mxu0 %v3700_v52  ;;  %2970 = vmatprep.subr.bf16.mxu1 %v3702_v55  ;;  %v3704_v52 = vcombine.high %v2799_v41, %v2801_v44  ;;  %v3706_v2 = vcombine.high %v2800_v45, %v2802_v46  ;;  %v3703_v55 = vcombine.low %v2799_v41, %v2801_v44 }
 0x93c   : > { %v3790_v56 = vpop.f32.mrb[28].mxu0  ;;  %v3812_v57 = vpop.f32.mrb[28].mxu1 }
 0x93d   : > { %v3791_v26 = vpop.f32.mrb[29].mxu0  ;;  %v3813_v27 = vpop.f32.mrb[29].mxu1 }
 0x93e   : > { %v3792_v58 = vadd.f32 %v3791_v26, %v3790_v56  ;;  %v3814_v59 = vadd.f32 %v3813_v27, %v3812_v57  ;;  %v3793_v60 = vpop.f32.mrb[30].mxu0  ;;  %v3815_v61 = vpop.f32.mrb[30].mxu1  ;;  %v3705_v56 = vcombine.low %v2800_v45, %v2802_v46  ;;  %v4196_v57 = vld [vmem:[%s4539_s20 + $0x340] sm:$0xff]  }
 0x93f   : > { %v3794_v62 = vpop.f32.mrb[31].mxu0  ;;  %v3816_v63 = vpop.f32.mrb[31].mxu1  ;;  %v4197_v26 = vld [vmem:[%s4539_s20 + $0x3c0] sm:$0xff]   ;;  %v4204_v60 = vld [vmem:[%s4539_s20 + $0x350] sm:$0xff]  }
 0x940   : > { %v2021_v0 = vadd.f32 %v3814_v59, %v3792_v58  ;;  %v4199_v27 = vld [vmem:[%s4539_s20 + $0x380] sm:$0xff]   ;;  %v4201_v58 = vld [vmem:[%s4539_s20 + $0x3c8] sm:$0xff]   ;;  %v4205_v61 = vld [vmem:[%s4539_s20 + $0x3d0] sm:$0xff]  }
 0x941   : > { %v4203_v59 = vld [vmem:[%s4539_s20 + $0x388] sm:$0xff]   ;;  %v4206_v62 = vld [vmem:[%s4539_s20 + $0x310] sm:$0xff]  }
 0x942   : > { %v4207_v63 = vld [vmem:[%s4539_s20 + $0x390] sm:$0xff]  }
 0x95c   : > { %v3834_v1 = vpop.f32.mrb[32].mxu0  ;;  %v3856_v3 = vpop.f32.mrb[32].mxu1 }
 0x95d   : > { %v3835_v5 = vpop.f32.mrb[33].mxu0  ;;  %v3857_v6 = vpop.f32.mrb[33].mxu1 }
 0x95e   : > { %v3836_v7 = vadd.f32 %v3835_v5, %v3834_v1  ;;  %v3858_v8 = vadd.f32 %v3857_v6, %v3856_v3  ;;  %v3837_v9 = vpop.f32.mrb[34].mxu0  ;;  %v3859_v10 = vpop.f32.mrb[34].mxu1  ;;  %v4210_v1 = vld [vmem:[%s4539_s20 + $0x318] sm:$0xff]   ;;  %v4212_v5 = vld [vmem:[%s4539_s20 + $0x360] sm:$0xff]  }
 0x95f   : > { %v3838_v12 = vpop.f32.mrb[35].mxu0  ;;  %v3860_v13 = vpop.f32.mrb[35].mxu1  ;;  %v4211_v3 = vld [vmem:[%s4539_s20 + $0x398] sm:$0xff]   ;;  %v4213_v6 = vld [vmem:[%s4539_s20 + $0x3e0] sm:$0xff]   ;;  %v4216_v9 = vld [vmem:[%s4539_s20 + $0x368] sm:$0xff]  }
 0x960   : > { %v2253_v14 = vadd.f32 %v3836_v7, %v2021_v0  ;;  %v4209_v0 = vld [vmem:[%s4539_s20 + $0x3d8] sm:$0xff]   ;;  %v4214_v7 = vld [vmem:[%s4539_s20 + $0x320] sm:$0xff]   ;;  %v4217_v10 = vld [vmem:[%s4539_s20 + $0x3e8] sm:$0xff]  }
 0x961   : > { %v4219_v12 = vld [vmem:[%s4539_s20 + $0x3a8] sm:$0xff]   ;;  %v4220_v13 = vld [vmem:[%s4539_s20 + $0x370] sm:$0xff]  }
 0x962   : > { %v4871_v4 = vadd.f32 %v3858_v8, %v2253_v14  ;;  %v4215_v8 = vld [vmem:[%s4539_s20 + $0x3a0] sm:$0xff]   ;;  %v4221_v14 = vld [vmem:[%s4539_s20 + $0x3f0] sm:$0xff]  }
 0x964   : > { %v2466_v22 = vpop.f32.mrb[36].mxu0  ;;  %v2507_v23 = vpop.f32.mrb[36].mxu1 }
 0x965   : > { %v2467_v20 = vadd.f32 %v2466_v22, %v2375_v15  ;;  %v2508_v24 = vadd.f32 %v2507_v23, %v2383_v18  ;;  %v2468_v16 = vpop.f32.mrb[37].mxu0  ;;  %v2509_v17 = vpop.f32.mrb[37].mxu1  ;;  %v4222_v15 = vld [vmem:[%s4539_s20 + $0x330] sm:$0xff]   ;;  %v4226_v22 = vld [vmem:[%s4539_s20 + $0x338] sm:$0xff]  }
 0x966   : > { %v2469_v25 = vadd.f32 %v2468_v16, %v2379_v19  ;;  %v2510_v29 = vadd.f32 %v2509_v17, %v2387_v21  ;;  %v2470_v31 = vpop.f32.mrb[38].mxu0  ;;  %v2511_v34 = vpop.f32.mrb[38].mxu1  ;;  %v4223_v18 = vld [vmem:[%s4539_s20 + $0x3b0] sm:$0xff]   ;;  %v4224_v19 = vld [vmem:[%s4539_s20 + $0x378] sm:$0xff]  }
 0x967   : > { %v2514_v35 = vmax.f32 %v2467_v20, 0.0  ;;  %v2516_v36 = vmax.f32 %v2508_v24, 0.0  ;;  %v2471_v39 = vpop.f32.mrb[39].mxu0  ;;  %v2512_v40 = vpop.f32.mrb[39].mxu1  ;;  %v4225_v21 = vld [vmem:[%s4539_s20 + $0x3f8] sm:$0xff]  }
 0x968   : > { %v2515_v42 = vmax.f32 %v2469_v25, 0.0  ;;  %v2517_v43 = vmax.f32 %v2510_v29, 0.0  ;;  %v4227_v23 = vld [vmem:[%s4539_s20 + $0x3b8] sm:$0xff]  }
 0x969   : > { %v2518_v33 = vpack.c.bf16 %v2514_v35, %v2514_v35  ;;  %v2520_v51 = vpack.c.bf16 %v2516_v36, %v2516_v36  ;;  %v2803_v35 = vld [vmem:[%s4528_s12 + $0xc] sm:$0xf] }
 0x96a   : > { %v2519_v47 = vpack.c.bf16 %v2515_v42, %v2515_v42  ;;  %v2521_v50 = vpack.c.bf16 %v2517_v43, %v2517_v43  ;;  %v2872_v41 = vrot.slane %v2803_v35, %v4754_v37  ;;  %v2880_v42 = vrot.slane %v2803_v35, %v4756_v38 }
 0x96b   : > { %v2876_v44 = vrot.slane %v2803_v35, %v4746_v28  ;;  %v2884_v45 = vrot.slane %v2803_v35, %v4748_v30 }
 0x96c   : > { %2746 = vmatprep.mubr.bf16.mxu0 %v2519_v47  ;;  %2786 = vmatprep.mubr.bf16.mxu1 %v2521_v50 }
 0x96d   : > { %2747 = vmatmul.mubr.bf16.vlgmr.msra.gmra.mrb[40].mxu0 %v2518_v33  ;;  %2787 = vmatmul.mubr.bf16.vlgmr.msra.gmra.mrb[40].mxu1 %v2520_v51 }
 0x96e   : > { %2930 = vmatpush1.bf16.msra.mxu0 %v3699_v53  ;;  %2971 = vmatpush1.bf16.msra.mxu1 %v3701_v54  ;;  %v4198_v53 = vld [vmem:[%s4539_s20 + $0x300] sm:$0xff]   ;;  %v4200_v54 = vld [vmem:[%s4539_s20 + $0x348] sm:$0xff]  }
 0x96f   : > { %2931 = vmatprep.subr.bf16.mxu0 %v3704_v52  ;;  %2972 = vmatprep.subr.bf16.mxu1 %v3706_v2 }
 0x970   : > { %2961 = vmatprep.mubr.bf16.mxu0 %v4354_v32  ;;  %3002 = vmatprep.mubr.bf16.mxu1 %v4354_v32  ;;  %v4202_v32 = vld [vmem:[%s4539_s20 + $0x308] sm:$0xff]  }
 0x972   : > { %2932 = vmatpush1.bf16.msra.mxu0 %v3703_v55  ;;  %2973 = vmatpush1.bf16.msra.mxu1 %v3705_v56 }
 0x973   : > { %3906 = vmatprep.subr.bf16.mxu0 %v4196_v57  ;;  %3928 = vmatprep.subr.bf16.mxu1 %v4197_v26 }
 0x975   : > { %3707 = vmatmul.mubr.msk.bf16.vlgmr.msra.gmra.mrb[44].mxu0 %vm676_vm2, %v4696_v49  ;;  %3708 = vmatmul.mubr.msk.bf16.vlgmr.msra.gmra.mrb[44].mxu1 %vm676_vm2, %v4696_v49  ;;  %v4208_v49 = vld [vmem:[%s4539_s20 + $0x358] sm:$0xff]   ;;  %s5065_s20 = sld [smem:[#allocation9_spill]] }
 0x976   : > { %3907 = vmatpush3.bf16.msra.mxu0 %v4198_v53  ;;  %3929 = vmatpush3.bf16.msra.mxu1 %v4199_v27 }
 0x977   : > { %3908 = vmatprep.subr.bf16.mxu0 %v4200_v54  ;;  %3930 = vmatprep.subr.bf16.mxu1 %v4201_v58 }
 0x97a   : > { %3909 = vmatpush3.bf16.msra.mxu0 %v4202_v32  ;;  %3931 = vmatpush3.bf16.msra.mxu1 %v4203_v59 }
 0x97b   : > { %3910 = vmatprep.subr.bf16.mxu0 %v4204_v60  ;;  %3932 = vmatprep.subr.bf16.mxu1 %v4205_v61  ;;  %s3745_s16 = sshll.u32 %s5065_s20, 7 }
 0x97c   : > { %s4946_s15 = scalar_lea.hbm %s5069_s29, %s3745_s16 }
 0x97e   : > { %3911 = vmatpush3.bf16.msra.mxu0 %v4206_v62  ;;  %3933 = vmatpush3.bf16.msra.mxu1 %v4207_v63 }
 0x97f   : > { %3912 = vmatprep.subr.bf16.mxu0 %v4208_v49  ;;  %3934 = vmatprep.subr.bf16.mxu1 %v4209_v0 }
 0x982   : > { %3913 = vmatpush3.bf16.msra.mxu0 %v4210_v1  ;;  %3935 = vmatpush3.bf16.msra.mxu1 %v4211_v3 }
 0x983   : > { %3914 = vmatprep.subr.bf16.mxu0 %v4212_v5  ;;  %3936 = vmatprep.subr.bf16.mxu1 %v4213_v6  ;;  %v3741_v6 = vld [vmem:[%s630_s18] ss:$0 sm:$0xff]  ;;  %s5066_s18 = sld [smem:[#allocation6_spill]] }
 0x986   : > { %3915 = vmatpush3.bf16.msra.mxu0 %v4214_v7  ;;  %3937 = vmatpush3.bf16.msra.mxu1 %v4215_v8 }
 0x987   : > { %3916 = vmatprep.subr.bf16.mxu0 %v4216_v9  ;;  %3938 = vmatprep.subr.bf16.mxu1 %v4217_v10 }
 0x98a   : > { %3917 = vmatpush3.bf16.msra.mxu0 %v4218_v11  ;;  %3939 = vmatpush3.bf16.msra.mxu1 %v4219_v12 }
 0x98b   : > { %3918 = vmatprep.subr.bf16.mxu0 %v4220_v13  ;;  %3940 = vmatprep.subr.bf16.mxu1 %v4221_v14 }
 0x98e   : > { %3919 = vmatpush3.bf16.msra.mxu0 %v4222_v15  ;;  %3941 = vmatpush3.bf16.msra.mxu1 %v4223_v18 }
 0x98f   : > { %3920 = vmatprep.subr.bf16.mxu0 %v4224_v19  ;;  %3942 = vmatprep.subr.bf16.mxu1 %v4225_v21 }
 0x992   : > { %3921 = vmatpush3.bf16.msra.mxu0 %v4226_v22  ;;  %3943 = vmatpush3.bf16.msra.mxu1 %v4227_v23  ;;  %v3742_v22 = vld [vmem:[%s639_s5] ss:$0 sm:$0xff]  ;;  %s5071_s5 = sand.u32 1, %s5066_s18  }
 0x993   : > { %s3332_s1 = scalar_lea.sflag [#allocation3], %s5071_s5 }
 0xa40   : > { %v3878_v20 = vpop.f32.mrb[40].mxu0  ;;  %v3900_v24 = vpop.f32.mrb[40].mxu1 }
 0xa41   : > { %v3879_v16 = vpop.f32.mrb[41].mxu0  ;;  %v3901_v17 = vpop.f32.mrb[41].mxu1 }
 0xa42   : > { %v3880_v25 = vadd.f32 %v3879_v16, %v3878_v20  ;;  %v3902_v29 = vadd.f32 %v3901_v17, %v3900_v24  ;;  %v3881_v31 = vpop.f32.mrb[42].mxu0  ;;  %v3903_v34 = vpop.f32.mrb[42].mxu1  ;;  %v3743_v20 = vld [vmem:[%s642_s26] ss:$0 sm:$0xff]  ;;  %s4355_s26 = smov [#allocation2]  }
 0xa43   : > { %v3882_v36 = vpop.f32.mrb[43].mxu0  ;;  %v3904_v39 = vpop.f32.mrb[43].mxu1  ;;  %s4252_s3 = sshll.u32 %s4355_s26, 4  ;;  %s4253_s3 = int_to_ptr.vmem [resolvable:$false] %s4252_s3 }
 0xa44   : > { %v2789_v40 = vadd.f32 %v3902_v29, %v3880_v25  ;;  %s4254_s6 = scalar_lea.vmem %s4253_s3, 256  ;;  %p4255_p5 = scmp.lt.s32.totalorder %s4948_s22, %s4253_s3 }
 0xa45   : > { %p4256_p6 = scmp.lt.s32.totalorder %s4254_s6, %s4248_s30 }
 0xa46   : > { %v2794_v43 = vadd.f32 %v2789_v40, %v4871_v4 }
 0xa47   : > { %p4257_p7 = por %p4256_p6, %p4255_p5 }
 0xa48   : > { %v2963_v46 = vpop.f32.mrb[44].mxu0  ;;  %v3004_v47 = vpop.f32.mrb[44].mxu1 }
 0xa49   : > { %v2964_v50 = vadd.f32 %v2963_v46, %v2872_v41  ;;  %v3005_v33 = vadd.f32 %v3004_v47, %v2880_v42  ;;  %v2965_v51 = vpop.f32.mrb[45].mxu0  ;;  %v3006_v52 = vpop.f32.mrb[45].mxu1  ;;  %p4258_p8 = pnand %p4257_p7, %p4251_p4 }
 0xa4a   : > { %v2966_v2 = vadd.f32 %v2965_v51, %v2876_v44  ;;  %v3007_v55 = vadd.f32 %v3006_v52, %v2884_v45  ;;  %v2967_v56 = vpop.f32.mrb[46].mxu0  ;;  %v3008_v57 = vpop.f32.mrb[46].mxu1 }
 0xa4b   : > { %v3011_v26 = vmax.f32 %v2964_v50, 0.0  ;;  %v3013_v37 = vmax.f32 %v3005_v33, 0.0  ;;  %v2968_v53 = vpop.f32.mrb[47].mxu0  ;;  %v3009_v38 = vpop.f32.mrb[47].mxu1 }
 0xa4c   : > { %v3012_v27 = vmax.f32 %v2966_v2, 0.0  ;;  %v3014_v4 = vmax.f32 %v3007_v55, 0.0 }
 0xa4d   : > { %v3015_v58 = vpack.c.bf16 %v3011_v26, %v3011_v26  ;;  %v3017_v30 = vpack.c.bf16 %v3013_v37, %v3013_v37 }
 0xa4e   : > { %v3016_v54 = vpack.c.bf16 %v3012_v27, %v3012_v27  ;;  %v3018_v28 = vpack.c.bf16 %v3014_v4, %v3014_v4 }
 0xa50   : > { %3243 = vmatprep.mubr.bf16.mxu0 %v3016_v54  ;;  %3283 = vmatprep.mubr.bf16.mxu1 %v3018_v28 }
 0xa51   : > { %3244 = vmatmul.mubr.bf16.vlgmr.msra.gmra.mrb[48].mxu0 %v3015_v58  ;;  %3284 = vmatmul.mubr.bf16.vlgmr.msra.gmra.mrb[48].mxu1 %v3017_v30 }
 0xb24   : > { %v3922_v32 = vpop.f32.mrb[48].mxu0  ;;  %v3944_v59 = vpop.f32.mrb[48].mxu1 }
 0xb25   : > { %v3923_v60 = vpop.f32.mrb[49].mxu0  ;;  %v3945_v61 = vpop.f32.mrb[49].mxu1 }
 0xb26   : > { %v3924_v62 = vadd.f32 %v3923_v60, %v3922_v32  ;;  %v3946_v63 = vadd.f32 %v3945_v61, %v3944_v59  ;;  %v3925_v49 = vpop.f32.mrb[50].mxu0  ;;  %v3947_v0 = vpop.f32.mrb[50].mxu1 }
 0xb27   : > { %v3926_v1 = vpop.f32.mrb[51].mxu0  ;;  %v3948_v3 = vpop.f32.mrb[51].mxu1 }
 0xb28   : > { %v3286_v5 = vadd.f32 %v3946_v63, %v3924_v62 }
 0xb2a   : > { %v3291_v7 = vadd.f32 %v3286_v5, %v2794_v43 }
 0xb2c   : > { %v3299_v8 = vadd.f32 %v3741_v6, %v3291_v7 }
 0xb2e   : > { %v3300_v9 = vadd.f32 %v3299_v8, %v4692_v48 }
 0xb30   : > { %v3303_v10 = vsel %vm676_vm2, %v3300_v9, 0.0 }
 0xb31   : > { %3304 = vadd.xlane.f32.xlu0 %v3303_v10 }
 0xbbe   : > { %v3305_v11 = vpop.xlane.xlu0 %3304 }
 0xbbf   : > { %v3306_v12 = vmul.f32 0.03125, %v3305_v11 }
 0xbc1   : > { %v3307_v13 = vsub.f32 %v3300_v9, %v3306_v12 }
 0xbc3   : > { %v3308_v14 = vmul.f32 %v3307_v13, %v3307_v13 }
 0xbc5   : > { %v3309_v15 = vsel %vm676_vm2, %v3308_v14, 0.0 }
 0xbc6   : > { %3310 = vadd.xlane.f32.xlu1 %v3309_v15 }
 0xc53   : > { %v3311_v18 = vpop.xlane.xlu1 %3310 }
 0xc54   : > { %v3312_v19 = vmul.f32 0.03125, %v3311_v18 }
 0xc56   : > { %v3313_v21 = vadd.f32 1e-05, %v3312_v19 }
 0xc58   : > { %4246 = vrsqrt.f32 %v3313_v21 }
 0xc62   : > { %v4247_v48 = vpop.eup %4246 }
 0xc63   : > { %v3315_v23 = vmul.f32 %v4247_v48, %v3307_v13 }
 0xc65   : > { %v3322_v24 = vmul.f32 %v3742_v22, %v3315_v23 }
 0xc67   : > { %v3329_v16 = vadd.f32 %v3743_v20, %v3322_v24 }
 0xc69   : > { %3330 = vst.msk [vmem:[%s4561_s7] sm:$0xff] %vm676_vm2, %v3329_v16 }
 0xc6a   : > { %4261 = shalt.err (!%p4258_p8)
}
 0xc6b   : > { %s4262_s7 = scalar_lea.hbm %s4946_s15, 128  ;;  %s4266_s25 = scalar_lea.hbm %s5070_s13, 256 }
 0xc6c   : > { %p4263_p10 = scmp.ne.s32.totalorder %s4946_s15, %s4262_s7  ;;  %p4267_p13 = scmp.lt.u32.totalorder %s4946_s15, %s5070_s13 }
 0xc6d   : > { %p4268_p0 = scmp.lt.u32.totalorder %s4266_s25, %s4262_s7  ;;  %p4270_p2 = scmp.lt.u32.totalorder %s4262_s7, %s4946_s15 }
 0xc6e   : > { %p4264_p11 = pnand %p4263_p10, %p4475_p3 }
 0xc6f   : > { %p4269_p1 = por %p4268_p0, %p4267_p13 }
 0xc70   : > { %p4265_p12 = pneg %p4264_p11 }
 0xc71   : > { %p4271_p4 = por %p4270_p2, %p4269_p1 }
 0xc73   : > { %p4272_p5 = pnand %p4271_p4, %p4265_p12 }
 0xc75   : > { %4275 = shalt.err (!%p4272_p5)
}
 0xc76   : > { %4014 = dma.vmem_to_hbm [thread:$0]  (%p4475_p3), %s4948_s22, 128, %s4946_s15, %s3332_s1  }
 0xc77 PF: > { %s5072_s27 = sld [smem:[#allocation12_spill]]  ;;  %s5073_s21 = sld [smem:[#allocation5_spill]] }
 0xc7d   : > { %p4020_p6 = scmp.ge.s32.totalorder %s5072_s27, 2  ;;  %s3357_s19 = sand.u32 1, %s5073_s21  }
 0xc7e   : > { %s3358_s28 = scalar_lea.sflag [#allocation3], %s3357_s19 }
 0xc7f   : > { %p4017_p7 = pnand %p4020_p6, %p4485_p9 }
 0xc81   : > { %4309 = dma.done.wait (!%p4017_p7), %s3358_s28, 128  }
 0xc82   : > { %4311 = vsyncadd (!%p4017_p7), %s3358_s28, 4294967168  ;;  %s26_s15 = sadd.s32 1, %s5072_s27   ;;  %s5075_s25 = sld [smem:[#allocation6_spill]] }
 0xc83   : > { %p23_p8 = scmp.ge.s32.totalorder %s26_s15, 6   ;;  %s5076_s26 = sld [smem:[#allocation7_spill]] }
 0xc84   : > { %s5077_s27 = sld [smem:[#allocation17_spill]]  ;;  %s5078_s28 = sld [smem:[#allocation10_spill]] }
 0xc85   : > { %s5079_s29 = sld [smem:[#allocation11_spill]]  ;;  %s5080_s30 = sld [smem:[#allocation13_spill]] }
 0xc86   : > { %s5081_s14 = sld [smem:[#allocation15_spill]]  ;;  %25 = sbr.rel (!%p23_p8) target bundleno = 14 (0xe), region = 147 }
 0xc8d   :  { %3363 = vsyncpa [#allocation3], 1 }
 0xc8e   :  { %3365 = vsyncpa [#allocation3 + $0x1], 1 }

</bundles_post_ra>
